<compile_context>
chip_gen: v5e
topology: v5e:2x2
jax: 0.10.0
libtpu: 0.0.40
codegen_flags: <defaults>
</compile_context>

<pallas_src>
import math

import jax
import jax.numpy as jnp
from jax.experimental import pallas as pl
from jax.experimental.pallas import tpu as pltpu

_LANE = 128
_SQRT_2_OVER_PI = math.sqrt(2.0 / math.pi)
_GELU_C = 0.044715


def _connector_kernel(x_ref, w1_ref, b1_ref, w2_ref, b2_ref, o_ref):
    x = x_ref[...]                                            # [tm, D] narrow dtype

    # Linear 1 on the MXU: narrow operands, f32 accumulation; bias pre-cast f32.
    h = jnp.dot(x, w1_ref[...], preferred_element_type=jnp.float32) + b1_ref[...]

    # tanh-approx GELU in the input dtype (bf16 on v6e/v7x -> bf16 VALU + EUP
    # tanh; v5e falls back to f32 VALU internally).
    # TODO(synk): switch back to exact erf GELU if bit-faithfulness to
    # torch.nn.GELU() (default = erf) matters more than the VALU/EUP win.
    a = h.astype(x.dtype)
    g = 0.5 * a * (1.0 + jnp.tanh(_SQRT_2_OVER_PI * (a + _GELU_C * a * a * a)))

    # Linear 2 on the MXU (narrow operands, f32 accumulation) + fused epilogue:
    # bias + residual in f32, single lane-dense store.
    y = jnp.dot(g, w2_ref[...], preferred_element_type=jnp.float32)
    o_ref[...] = (y + b2_ref[...] + x.astype(jnp.float32)).astype(o_ref.dtype)


def _round_up(v, m):
    return ((v + m - 1) // m) * m


def _pad_axis(a, axis, multiple):
    pad = _round_up(a.shape[axis], multiple) - a.shape[axis]
    if pad == 0:
        return a
    widths = [(0, 0)] * a.ndim
    widths[axis] = (0, pad)
    return jnp.pad(a, widths)


def prepare_connector_params(w1, b1, w2, b2):
    """One-time prep (hoisted out of forward): pad weights to lane-dense dims,
    pre-cast biases to f32 row vectors.

    w1: [D_small, H], b1: [H], w2: [H, D_proj], b2: [D_proj]
    (weights stored [in, out], i.e. transposed vs torch.nn.Linear's [out, in]).
    Zero padding is exact: padded hidden units get bias 0 -> GELU(0)=0 ->
    contribute nothing; padded output cols are sliced off by the wrapper.
    """
    w1p = _pad_axis(_pad_axis(w1, 0, _LANE), 1, _LANE)
    w2p = _pad_axis(_pad_axis(w2, 0, _LANE), 1, _LANE)
    b1p = _pad_axis(b1.astype(jnp.float32).reshape(1, -1), 1, _LANE)
    b2p = _pad_axis(b2.astype(jnp.float32).reshape(1, -1), 1, _LANE)
    return w1p, b1p, w2p, b2p


def _pick_row_block(n, requested):
    # >= 4 grid steps so each v7x TensorCore sees >= 2 pipelined steps (DMA of
    # the next x tile hides behind this tile's matmuls); keep sublane-aligned.
    return max(8, min(requested, _round_up(pl.cdiv(n, 4), 8)))


def connector_forward(x, params, *, row_block=512):
    """Connector forward: GELU_tanh(x @ W1 + b1) @ W2 + b2 + x.

    `params` comes from prepare_connector_params (padded weights, f32 biases).
    """
    w1p, b1p, w2p, b2p = params
    n, d_small = x.shape
    d_pad, h_pad = w1p.shape
    d_out_pad = w2p.shape[1]
    assert w2p.shape[0] == h_pad
    assert d_out_pad == d_pad, "residual requires projected_dim == small_embedding_dim"
    assert _round_up(d_small, _LANE) == d_pad

    # Only copy x if its feature dim is not already lane-dense (no-op here).
    xp = _pad_axis(x, 1, _LANE) if d_small != d_pad else x

    row_block = _pick_row_block(n, row_block)
    grid = (pl.cdiv(n, row_block),)   # ragged final block: writeback is clipped

    # VMEM budget: double-buffered x/out tiles, resident weights/biases, f32
    # accumulators + narrow GELU activation; ~4x headroom, capped at 48 MiB.
    isz = jnp.dtype(x.dtype).itemsize
    est = (2 * 2 * row_block * d_pad * isz                      # x/out tiles (dbl-buffered)
           + (d_pad * h_pad + h_pad * d_out_pad) * isz          # resident weights
           + 4 * (h_pad + d_out_pad)                            # f32 biases
           + 4 * row_block * (h_pad + d_out_pad)                # f32 accumulators
           + isz * row_block * h_pad)                           # narrow GELU activation
    vmem_limit = int(min(max(4 * est, 2 << 20), 48 << 20))

    out = pl.pallas_call(
        _connector_kernel,
        out_shape=jax.ShapeDtypeStruct((n, d_out_pad), x.dtype),
        grid_spec=pltpu.PrefetchScalarGridSpec(
            num_scalar_prefetch=0,
            grid=grid,
            in_specs=[
                pl.BlockSpec((row_block, d_pad), lambda i: (i, 0)),   # x tile
                pl.BlockSpec((d_pad, h_pad), lambda i: (0, 0)),       # W1 (resident)
                pl.BlockSpec((1, h_pad), lambda i: (0, 0)),           # b1 (f32)
                pl.BlockSpec((h_pad, d_out_pad), lambda i: (0, 0)),   # W2 (resident)
                pl.BlockSpec((1, d_out_pad), lambda i: (0, 0)),       # b2 (f32)
            ],
            out_specs=pl.BlockSpec((row_block, d_out_pad), lambda i: (i, 0)),
        ),
        compiler_params=pltpu.CompilerParams(
            dimension_semantics=("parallel",),
            vmem_limit_bytes=vmem_limit,
        ),
    )(xp, w1p, b1p, w2p, b2p)

    return out if d_small == d_out_pad else out[:, :d_small]


def _reference(x, w1, b1, w2, b2):
    # Mirrors kernel numerics: narrow matmul operands, f32 accumulation,
    # tanh-approx GELU in the input dtype.
    h = jnp.dot(x, w1, preferred_element_type=jnp.float32) + b1.astype(jnp.float32)
    a = h.astype(x.dtype)
    g = 0.5 * a * (1.0 + jnp.tanh(_SQRT_2_OVER_PI * (a + _GELU_C * a * a * a)))
    y = jnp.dot(g, w2, preferred_element_type=jnp.float32)
    return (y + b2.astype(jnp.float32) + x.astype(jnp.float32)).astype(x.dtype)


if __name__ == "__main__":
    # small_embedding_dim = projected_dim = 128, inner_dim = 256.
    # N = 500 is deliberately ragged: row_block resolves to 128 -> grid (4,),
    # so v7x megacore gets 2 pipelined steps per core and the last block's
    # out-of-bounds rows are clipped on store (no wrapper pad/slice copies).
    small_dim = 128
    inner_dim = 256
    proj_dim = 128
    n_rows = 500

    key = jax.random.PRNGKey(0)
    k_x, k_w1, k_b1, k_w2, k_b2 = jax.random.split(key, 5)

    dtype = jnp.bfloat16  # narrow MXU operands; accumulation stays f32 in-kernel
    x = jax.random.normal(k_x, (n_rows, small_dim), jnp.float32).astype(dtype)
    # Deterministic synthetic parameters (not a checkpoint load).
    w1 = (jax.random.normal(k_w1, (small_dim, inner_dim), jnp.float32) * 0.05).astype(dtype)
    b1 = (jax.random.normal(k_b1, (inner_dim,), jnp.float32) * 0.01).astype(dtype)
    w2 = (jax.random.normal(k_w2, (inner_dim, proj_dim), jnp.float32) * 0.05).astype(dtype)
    b2 = (jax.random.normal(k_b2, (proj_dim,), jnp.float32) * 0.01).astype(dtype)

    params = prepare_connector_params(w1, b1, w2, b2)   # one-time (hoisted) prep
    out = connector_forward(x, params, row_block=512)
    out = jax.block_until_ready(out)
    assert out.shape == (n_rows, proj_dim)
    assert out.dtype == x.dtype

    ref = _reference(x, w1, b1, w2, b2)
    assert jnp.allclose(out.astype(jnp.float32), ref.astype(jnp.float32),
                        atol=3e-2, rtol=3e-2), "mismatch vs reference"

    print("KERNEL_OK")
</pallas_src>

<mosaic_0001>
module attributes {stable_mosaic.version = 11 : i64} {
  func.func @_connector_kernel(%arg0: i32, %arg1: memref<128x128xbf16, #tpu.memory_space<vmem>>, %arg2: memref<128x256xbf16, #tpu.memory_space<vmem>>, %arg3: memref<1x256xf32, #tpu.memory_space<vmem>>, %arg4: memref<256x128xbf16, #tpu.memory_space<vmem>>, %arg5: memref<1x128xf32, #tpu.memory_space<vmem>>, %arg6: memref<128x128xbf16, #tpu.memory_space<vmem>>) attributes {dimension_semantics = [#tpu.dimension_semantics<parallel>], iteration_bounds = array<i64: 4>, scalar_prefetch = 0 : i64, scratch_operands = 0 : i64, tpu.core_type = #tpu.core_type<tc>, window_params = [{transform_indices = @transform_0, window_bounds = array<i64: 128, 128>}, {pipeline_mode = #tpu.pipeline_mode<synchronous>, transform_indices = @transform_1, window_bounds = array<i64: 128, 256>}, {pipeline_mode = #tpu.pipeline_mode<synchronous>, transform_indices = @transform_2, window_bounds = array<i64: 1, 256>}, {pipeline_mode = #tpu.pipeline_mode<synchronous>, transform_indices = @transform_3, window_bounds = array<i64: 256, 128>}, {pipeline_mode = #tpu.pipeline_mode<synchronous>, transform_indices = @transform_4, window_bounds = array<i64: 1, 128>}, {transform_indices = @transform_5, window_bounds = array<i64: 128, 128>}]} {
    %c0 = arith.constant 0 : index
    %c0_0 = arith.constant 0 : index
    %0 = vector.load %arg1[%c0, %c0_0] : memref<128x128xbf16, #tpu.memory_space<vmem>>, vector<128x128xbf16>
    %c0_1 = arith.constant 0 : index
    %c0_2 = arith.constant 0 : index
    %1 = vector.load %arg2[%c0_1, %c0_2] : memref<128x256xbf16, #tpu.memory_space<vmem>>, vector<128x256xbf16>
    %cst = arith.constant dense<0.000000e+00> : vector<128x256xf32>
    %2 = tpu.matmul %0, %1, %cst {dimension_numbers = #tpu.dot_dimension_numbers<[1], [0], [0], [1], [0, 0, 1, 1], [], []>} : vector<128x128xbf16>, vector<128x256xbf16>, vector<128x256xf32> -> vector<128x256xf32>
    %c0_3 = arith.constant 0 : index
    %c0_4 = arith.constant 0 : index
    %3 = vector.load %arg3[%c0_3, %c0_4] : memref<1x256xf32, #tpu.memory_space<vmem>>, vector<1x256xf32>
    %4 = vector.broadcast %3 : vector<1x256xf32> to vector<128x256xf32>
    %5 = arith.addf %2, %4 : vector<128x256xf32>
    %6 = arith.truncf %5 : vector<128x256xf32> to vector<128x256xbf16>
    %cst_5 = arith.constant 5.000000e-01 : bf16
    %7 = vector.broadcast %cst_5 : bf16 to vector<128x256xbf16>
    %8 = arith.mulf %7, %6 : vector<128x256xbf16>
    %cst_6 = arith.constant 4.467770e-02 : bf16
    %9 = vector.broadcast %cst_6 : bf16 to vector<128x256xbf16>
    %10 = arith.mulf %9, %6 : vector<128x256xbf16>
    %11 = arith.mulf %10, %6 : vector<128x256xbf16>
    %12 = arith.mulf %11, %6 : vector<128x256xbf16>
    %13 = arith.addf %6, %12 : vector<128x256xbf16>
    %cst_7 = arith.constant 7.968750e-01 : bf16
    %14 = vector.broadcast %cst_7 : bf16 to vector<128x256xbf16>
    %15 = arith.mulf %14, %13 : vector<128x256xbf16>
    %16 = math.tanh %15 : vector<128x256xbf16>
    %cst_8 = arith.constant 1.000000e+00 : bf16
    %17 = vector.broadcast %cst_8 : bf16 to vector<128x256xbf16>
    %18 = arith.addf %17, %16 : vector<128x256xbf16>
    %19 = arith.mulf %8, %18 : vector<128x256xbf16>
    %c0_9 = arith.constant 0 : index
    %c0_10 = arith.constant 0 : index
    %20 = vector.load %arg4[%c0_9, %c0_10] : memref<256x128xbf16, #tpu.memory_space<vmem>>, vector<256x128xbf16>
    %cst_11 = arith.constant dense<0.000000e+00> : vector<128x128xf32>
    %21 = tpu.matmul %19, %20, %cst_11 {dimension_numbers = #tpu.dot_dimension_numbers<[1], [0], [0], [1], [0, 0, 1, 1], [], []>} : vector<128x256xbf16>, vector<256x128xbf16>, vector<128x128xf32> -> vector<128x128xf32>
    %c0_12 = arith.constant 0 : index
    %c0_13 = arith.constant 0 : index
    %22 = vector.load %arg5[%c0_12, %c0_13] : memref<1x128xf32, #tpu.memory_space<vmem>>, vector<1x128xf32>
    %23 = vector.broadcast %22 : vector<1x128xf32> to vector<128x128xf32>
    %24 = arith.addf %21, %23 : vector<128x128xf32>
    %25 = arith.extf %0 : vector<128x128xbf16> to vector<128x128xf32>
    %26 = arith.addf %24, %25 : vector<128x128xf32>
    %27 = arith.truncf %26 : vector<128x128xf32> to vector<128x128xbf16>
    %c0_14 = arith.constant 0 : index
    %c0_15 = arith.constant 0 : index
    %28 = vector.load %arg6[%c0_14, %c0_15] : memref<128x128xbf16, #tpu.memory_space<vmem>>, vector<128x128xbf16>
    tpu.vector_store %arg6[%c0_14, %c0_15], %27 {strides = array<i32>} : memref<128x128xbf16, #tpu.memory_space<vmem>>, vector<128x128xbf16>,
    return
  }
  func.func @transform_0(%arg0: i32) -> (i32, i32) {
    %c0_i32 = arith.constant 0 : i32
    %c0_i32_0 = arith.constant 0 : i32
    return %arg0, %c0_i32 : i32, i32
  }
  func.func @transform_1(%arg0: i32) -> (i32, i32) {
    %c0_i32 = arith.constant 0 : i32
    %c0_i32_0 = arith.constant 0 : i32
    %c0_i32_1 = arith.constant 0 : i32
    return %c0_i32, %c0_i32_0 : i32, i32
  }
  func.func @transform_2(%arg0: i32) -> (i32, i32) {
    %c0_i32 = arith.constant 0 : i32
    %c0_i32_0 = arith.constant 0 : i32
    %c0_i32_1 = arith.constant 0 : i32
    return %c0_i32, %c0_i32_0 : i32, i32
  }
  func.func @transform_3(%arg0: i32) -> (i32, i32) {
    %c0_i32 = arith.constant 0 : i32
    %c0_i32_0 = arith.constant 0 : i32
    %c0_i32_1 = arith.constant 0 : i32
    return %c0_i32, %c0_i32_0 : i32, i32
  }
  func.func @transform_4(%arg0: i32) -> (i32, i32) {
    %c0_i32 = arith.constant 0 : i32
    %c0_i32_0 = arith.constant 0 : i32
    %c0_i32_1 = arith.constant 0 : i32
    return %c0_i32, %c0_i32_0 : i32, i32
  }
  func.func @transform_5(%arg0: i32) -> (i32, i32) {
    %c0_i32 = arith.constant 0 : i32
    %c0_i32_0 = arith.constant 0 : i32
    return %arg0, %c0_i32 : i32, i32
  }
}

</mosaic_0001>

<bundles_post_ra>
// kernel: tpu_custom_call.1
= control target key start
LH: loop header
LB: loop body
LE: loop exit
PB: predicated region body
PF: predicated region fallthrough
CT: control target
= control target key end

     0   :  { %s3080_s0 = inlined_call_operand.hbm [shape: bf16[500,128], index: 0, kind: input, shape index: {}]   ;;  %s3081_s1 = inlined_call_operand.hbm [shape: bf16[128,256], index: 1, kind: input, shape index: {}]   ;;  %s3082_s2 = inlined_call_operand.hbm [shape: f32[1,256], index: 2, kind: input, shape index: {}]   ;;  %s3083_s3 = inlined_call_operand.hbm [shape: bf16[256,128], index: 3, kind: input, shape index: {}]   ;;  %s3084_s4 = inlined_call_operand.vmem [shape: f32[1,128], index: 4, kind: input, shape index: {}]   ;;  %s3085_s5 = inlined_call_operand.hbm [shape: bf16[500,128], index: 5, kind: output, shape index: {}]  }
   0x1   :  { %3087 = sst [smem:[#allocation15_spill]] %s3081_s1 }
   0x2   :  { %3088 = sst [smem:[#allocation16_spill]] %s3082_s2 }
   0x3   :  { %10 = vsyncpa [#allocation3], 0 }
   0x4   :  { %12 = vsyncpa [#allocation3 + $0x1], 0 }
   0x5   :  { %13 = vsyncpa [#allocation6], 0 }
   0x6   :  { %14 = vsyncpa [#allocation9], 0 }
   0x7   :  { %15 = vsyncpa [#allocation4], 0 }
   0x8   :  { %17 = vsyncpa [#allocation4 + $0x1], 0  ;;  %s2408_s18 = smov 0   ;;  %s2410_s19 = smov 0  }
   0x9   :  { %s2412_s20 = smov 0   ;;  %s2414_s21 = smov 0  }
   0xa LB: > { %s2429_s22 = sadd.s32 4294967295, %s2363_s21   ;;  %s1729_s23 = sadd.s32 4294967294, %s2363_s21   ;;  %s2363_s21 = sphi %s2414_s21, %s3107_s21   ;;  %s2359_s20 = sphi %s2412_s20, %s3106_s20   ;;  %s2355_s19 = sphi %s2410_s19, %s3105_s19   ;;  %s2351_s18 = sphi %s2408_s18, %s3104_s18  }
   0xb   : > { %s2433_s24 = sadd.s32 1, %s2363_s21   ;;  %s30_s25 = sadd.s32 1, %s2359_s20 }
   0xc   : > { %s27_s26 = ssub.s32 %s2363_s21, %s2433_s24  ;;  %p37_p0 = scmp.ne.s32.totalorder %s2359_s20, %s2355_s19 }
   0xd   : > { %p28_p1 = scmp.eq.s32.totalorder %s27_s26, 0  ;;  %p38_p2 = scmp.eq.s32.totalorder %s2363_s21, 0 }
   0xe   : > { %p43_p3 = scmp.ne.s32.totalorder %s2355_s19, %s2351_s18  ;;  %p3086_p4 = scmp.eq.s32.totalorder %s2429_s22, 0 }
   0xf   : > { %s2445_s27 = scalar_select %p28_p1, %s2359_s20, %s30_s25  }
  0x10   : > { %p2447_p5 = por %p38_p2, %p37_p0  ;;  %p2453_p6 = por %p3086_p4, %p43_p3 }
  0x11   : > { %p151_p7 = scmp.eq.s32.totalorder %s2429_s22, 3  ;;  %p157_p8 = scmp.eq.s32.totalorder %s1729_s23, 3 }
  0x12   : > { %p1730_p9 = scmp.ge.s32.totalorder %s2363_s21, 1  ;;  %p164_p10 = scmp.lt.s32.totalorder %s2363_s21, 5 }
  0x13   : > { %p2460_p11 = por %p151_p7, %p37_p0  ;;  %p2464_p12 = por %p157_p8, %p43_p3 }
  0x14   : > { %p2468_p13 = pnand %p1730_p9, %p164_p10  ;;  %s3094_s1 = sld [smem:[#allocation15_spill]] }
  0x15   : > { %s3092_s6 = scalar_select %p2464_p12, 1, 0 }
  0x16   : > { %p2020_p1 = pneg %p2468_p13  ;;  %s2365_s11 = smov [#allocation5]  }
  0x17   : > { %s177_s12 = sshll.u32 %s2365_s11, 4  ;;  %s3096_s2 = sld [smem:[#allocation16_spill]]  ;;  %s178_s12 = int_to_ptr.vmem [resolvable:$true] %s177_s12 }
  0x18   : > { %p2479_p0 = pnand %p2020_p1, %p3086_p4  ;;  %s2366_s17 = smov 128  }
  0x19   : > { %s2367_s23 = smov 8   ;;  %s201_s8 = sshll.u32 %s3083_s3, 4  ;;  %s202_s8 = int_to_ptr.hbm [resolvable:$true] %s201_s8 }
  0x1a   : > { %s175_s10 = sshll.u32 %s3094_s1, 4  ;;  %s2368_s9 = smov [#allocation7]   ;;  %s176_s10 = int_to_ptr.hbm [resolvable:$true] %s175_s10 }
  0x1b   : > { %2023 = dma.hbm_to_vmem [thread:$0]  (!%p2479_p0), %s176_s10, 2048, %s178_s12, [#allocation6], %s2366_s17, %s2366_s17, %s2367_s23  }
  0x1c   : > { %s192_s11 = sshll.u32 %s2368_s9, 4  ;;  %s2369_s14 = smov [#allocation8]   ;;  %s193_s11 = int_to_ptr.vmem [resolvable:$true] %s192_s11 }
  0x1d   : > { %s190_s16 = sshll.u32 %s3096_s2, 4  ;;  %s203_s15 = sshll.u32 %s2369_s14, 4  ;;  %s191_s16 = int_to_ptr.hbm [resolvable:$true] %s190_s16  ;;  %s204_s15 = int_to_ptr.vmem [resolvable:$true] %s203_s15 }
  0x1e   : > { %2026 = dma.hbm_to_vmem [thread:$0]  (!%p2479_p0), %s191_s16, 32, %s193_s11, [#allocation6]  }
  0x1f   : > { %s2370_s1 = smov 64   ;;  %s2371_s2 = smov 4  }
  0x20   : > { %2029 = dma.hbm_to_vmem [thread:$0]  (!%p2479_p0), %s202_s8, 2048, %s204_s15, [#allocation9], %s2370_s1, %s2370_s1, %s2371_s2  }
  0x21   : > { %p1734_p2 = scmp.ge.s32.totalorder %s2363_s21, 4 }
  0x23   : > { %216 = sbr.rel (%p1734_p2) target bundleno = 76 (0x4c), region = 32 }
  0x28   : > { %219 = sbr.rel (!%p2447_p5) target bundleno = 76 (0x4c), region = 36  ;;  %s220_s10 = sand.u32 (%p2447_p5), 1, %s2359_s20  }
  0x29   : > { %s1736_s12 = sshll.u32 (%p2447_p5), %s2363_s21, 4  ;;  %s1735_s17 = sshll.u32 (%p2447_p5), %s220_s10, 6 }
  0x2a   : > { %s226_s23 = ssub.s32 (%p2447_p5), 63, %s1736_s12  ;;  %s2503_s1 = scalar_lea.sflag (%p2447_p5), [#allocation3], %s220_s10 }
  0x2b   : > { %p227_p3 = scmp.lt.s32.totalorder (%p2447_p5), %s226_s23, 16  ;;  %s224_s2 = scalar_lea.vmem (%p2447_p5), [#allocation2], %s1735_s17 }
  0x2d   : > { %s3109_s23 = smov (!%p227_p3, %s226_s23), 16 }
  0x2e   : > { %s1737_s16 = sshll.u32 %s3109_s23, 2 }
  0x2f   : > { %s230_s25 = ssub.s32 64, %s1737_s16 }
  0x30   : > { %s231_s13 = sshll.u32 %s230_s25, 4 }
  0x31   : > { %232 = vsyncadd %s2503_s1, %s231_s13  ;;  %p2506_p5 = scmp.ne.s32.totalorder %s1737_s16, 0  ;;  %s1917_s26 = sshll.u32 %s2363_s21, 6 }
  0x32   : > { %s235_s11 = scalar_lea.hbm %s3080_s0, %s1917_s26  ;;  %s2514_s14 = sshll.u32 %s224_s2, 4  ;;  %s240_s14 = int_to_ptr.vmem [resolvable:$true] %s2514_s14 }
  0x33   : > { %s237_s15 = sshll.u32 %s235_s11, 4  ;;  %s1741_s10 = sshll.u32 %s3109_s23, 6  ;;  %s2517_s15 = int_to_ptr.hbm [resolvable:$true] %s237_s15 }
  0x34   : > { %s2239_s12 = sshra.s32 %s2517_s15, 4  ;;  %s2241_s17 = sshrl.u32 %s1741_s10, 4  ;;  %s2240_s12 = int_to_ptr.hbm [resolvable:$true] %s2239_s12 }
  0x35   : > { %s2246_s16 = scalar_lea.hbm %s2240_s12, %s2241_s17  ;;  %s2250_s2 = scalar_lea.hbm %s3080_s0, 252 }
  0x36   : > { %p2247_p7 = scmp.ne.s32.totalorder %s2240_s12, %s2246_s16  ;;  %p2251_p10 = scmp.lt.s32.totalorder %s2240_s12, %s3080_s0 }
  0x37   : > { %p2252_p1 = scmp.lt.s32.totalorder %s2250_s2, %s2246_s16 }
  0x38   : > { %p2248_p8 = pnand %p2247_p7, %p2506_p5 }
  0x39   : > { %p2253_p0 = por %p2252_p1, %p2251_p10 }
  0x3a   : > { %p2249_p9 = pneg %p2248_p8 }
  0x3c   : > { %p2254_p2 = pnand %p2253_p0, %p2249_p9 }
  0x3e   : > { %2257 = shalt.err (!%p2254_p2)
}
  0x3f   : > { %s2258_s9 = sshra.s32 %s240_s14, 4  ;;  %s2372_s25 = smov [#allocation2]   ;;  %s2259_s9 = int_to_ptr.vmem [resolvable:$true] %s2258_s9 }
  0x40   : > { %s2265_s11 = scalar_lea.vmem %s2259_s9, %s2241_s17  ;;  %s2269_s13 = scalar_lea.vmem %s2372_s25, 128 }
  0x41   : > { %p2266_p3 = scmp.ne.s32.totalorder %s2259_s9, %s2265_s11  ;;  %p2271_p4 = scmp.lt.s32.totalorder %s2269_s13, %s2265_s11 }
  0x43   : > { %p2267_p7 = pnand %p2266_p3, %p2506_p5 }
  0x45   : > { %p2268_p8 = pneg %p2267_p7 }
  0x47   : > { %p2273_p12 = pnand %p2271_p4, %p2268_p8 }
  0x49   : > { %2276 = shalt.err (!%p2273_p12)
}
  0x4a   : > { %s2373_s12 = smov 64   ;;  %s2374_s16 = smov 4  }
  0x4b   : > { %245 = dma.hbm_to_vmem [thread:$0]  (%p2506_p5), %s2517_s15, %s1741_s10, %s240_s14, %s2503_s1, %s2373_s12, %s2373_s12, %s2374_s16  }
  0x4c PF: > { %251 = sbr.rel (%p2468_p13) target bundleno = 659 (0x293), region = 40  ;;  %s2546_s17 = sand.u32 (!%p2468_p13), 1, %s2355_s19  }
  0x4d   : > { %s1743_s2 = sshll.u32 (!%p2468_p13), %s2546_s17, 6  ;;  %s254_s26 = scalar_lea.sflag (!%p2468_p13), [#allocation3], %s2546_s17 }
  0x4e   : > { %s2552_s8 = scalar_lea.vmem (!%p2468_p13), [#allocation2], %s1743_s2 }
  0x51   : > { %2334 = dma.done.wait (%p2453_p6), %s254_s26, 1024  }
  0x52   : > { %2336 = vsyncadd (%p2453_p6), %s254_s26, 4294966272  ;;  %p3098_p4 = scmp.eq.s32.totalorder %s2429_s22, 0 }
  0x54   : > { %2338 = dma.done.wait (%p3098_p4), [#allocation6], 2080   ;;  %p3099_p12 = pmov %p3098_p4 }
  0x55   : > { %p3100_p13 = pmov %p3098_p4 }
  0x56   : > { %2340 = vsyncadd (%p3099_p12), [#allocation6], 4294965216 }
  0x57   : > { %2342 = dma.done.wait (%p3100_p13), [#allocation9], 2048   ;;  %p3101_p5 = pmov %p3098_p4 }
  0x58   : > { %v1838_v0 = vld [vmem:[#allocation5 + $0x70] sm:$0xf]  ;;  %v1941_v1 = vld [vmem:[#allocation5 + $0x74] sm:$0xf0]  ;;  %v1940_v2 = vld [vmem:[#allocation5 + $0x74] sm:$0xf] }
  0x59   : > { %2344 = vsyncadd (%p3101_p5), [#allocation9], 4294965248  ;;  %v1839_v3 = vor.u32 %v1941_v1, %v1838_v0  ;;  %v1840_v4 = vld [vmem:[#allocation5 + $0x78] sm:$0xf0]  ;;  %v1830_v5 = vld [vmem:[#allocation5 + $0x60] sm:$0xf] }
  0x5a   : > { %v1939_v6 = vld [vmem:[#allocation5 + $0x64] sm:$0xf0]  ;;  %v1843_v7 = vor.u32 %v1940_v2, %v1840_v4  ;;  %v1938_v8 = vld [vmem:[#allocation5 + $0x64] sm:$0xf]  ;;  %v1832_v9 = vld [vmem:[#allocation5 + $0x68] sm:$0xf0] }
  0x5b   : > { %476 = vmatpush.bf16.msra.mxu0 %v1839_v3  ;;  %v1831_v10 = vor.u32 %v1939_v6, %v1830_v5  ;;  %v1835_v11 = vor.u32 %v1938_v8, %v1832_v9  ;;  %v1822_v12 = vld [vmem:[#allocation5 + $0x50] sm:$0xf]  ;;  %v1937_v13 = vld [vmem:[#allocation5 + $0x54] sm:$0xf0]  ;;  %v1936_v14 = vld [vmem:[#allocation5 + $0x54] sm:$0xf] }
  0x5c   : > { %525 = vmatpush.bf16.msra.mxu1 %v1843_v7  ;;  %v1824_v15 = vld [vmem:[#allocation5 + $0x58] sm:$0xf0]  ;;  %v1823_v16 = vor.u32 %v1937_v13, %v1822_v12  ;;  %v1814_v18 = vld [vmem:[#allocation5 + $0x40] sm:$0xf]  ;;  %v1935_v19 = vld [vmem:[#allocation5 + $0x44] sm:$0xf0] }
  0x5d   : > { %v1827_v17 = vor.u32 %v1936_v14, %v1824_v15  ;;  %v1934_v20 = vld [vmem:[#allocation5 + $0x44] sm:$0xf]  ;;  %v1816_v21 = vld [vmem:[#allocation5 + $0x48] sm:$0xf0]  ;;  %v1815_v22 = vor.u32 %v1935_v19, %v1814_v18  ;;  %v1806_v24 = vld [vmem:[#allocation5 + $0x30] sm:$0xf] }
  0x5e   : > { %v1819_v23 = vor.u32 %v1934_v20, %v1816_v21  ;;  %v1933_v25 = vld [vmem:[#allocation5 + $0x34] sm:$0xf0]  ;;  %v1932_v26 = vld [vmem:[#allocation5 + $0x34] sm:$0xf]  ;;  %v1808_v27 = vld [vmem:[#allocation5 + $0x38] sm:$0xf0] }
  0x5f   : > { %477 = vmatpush.bf16.msra.mxu0 %v1831_v10  ;;  %v1807_v28 = vor.u32 %v1933_v25, %v1806_v24  ;;  %v1811_v29 = vor.u32 %v1932_v26, %v1808_v27  ;;  %v1798_v30 = vld [vmem:[#allocation5 + $0x20] sm:$0xf]  ;;  %v1931_v31 = vld [vmem:[#allocation5 + $0x24] sm:$0xf0]  ;;  %v1930_v32 = vld [vmem:[#allocation5 + $0x24] sm:$0xf] }
  0x60   : > { %526 = vmatpush.bf16.msra.mxu1 %v1835_v11  ;;  %v1800_v33 = vld [vmem:[#allocation5 + $0x28] sm:$0xf0]  ;;  %v1799_v34 = vor.u32 %v1931_v31, %v1798_v30  ;;  %v1790_v36 = vld [vmem:[#allocation5 + $0x10] sm:$0xf]  ;;  %v1929_v37 = vld [vmem:[#allocation5 + $0x14] sm:$0xf0] }
  0x61   : > { %v1803_v35 = vor.u32 %v1930_v32, %v1800_v33  ;;  %v1928_v38 = vld [vmem:[#allocation5 + $0x14] sm:$0xf]  ;;  %v1792_v39 = vld [vmem:[#allocation5 + $0x18] sm:$0xf0]  ;;  %v1791_v40 = vor.u32 %v1929_v37, %v1790_v36  ;;  %v1782_v42 = vld [vmem:[#allocation5] sm:$0xf] }
  0x62   : > { %v1795_v41 = vor.u32 %v1928_v38, %v1792_v39  ;;  %v1927_v43 = vld [vmem:[#allocation5 + $0x4] sm:$0xf0]  ;;  %v1926_v44 = vld [vmem:[#allocation5 + $0x4] sm:$0xf]  ;;  %v1784_v45 = vld [vmem:[#allocation5 + $0x8] sm:$0xf0] }
  0x63   : > { %478 = vmatpush.bf16.msra.mxu0 %v1823_v16  ;;  %v1783_v46 = vor.u32 %v1927_v43, %v1782_v42  ;;  %v1787_v47 = vor.u32 %v1926_v44, %v1784_v45  ;;  %v1918_v48 = vld [vmem:[%s2552_s8] sm:$0xff]  ;;  %v1919_v49 = vld [vmem:[%s2552_s8 + $0x8] sm:$0xff]  ;;  %v1920_v50 = vld [vmem:[%s2552_s8 + $0x10] sm:$0xff]  ;;  %s2987_s23 = scalar_lea.vmem [#allocation10], %s1743_s2  ;;  %s1605_s1 = scalar_lea.sflag [#allocation4], %s2546_s17 }
  0x64   : > { %527 = vmatpush.bf16.msra.mxu1 %v1827_v17  ;;  %v1921_v51 = vld [vmem:[%s2552_s8 + $0x18] sm:$0xff]  ;;  %v1922_v52 = vld [vmem:[%s2552_s8 + $0x20] sm:$0xff]  ;;  %v1923_v53 = vld [vmem:[%s2552_s8 + $0x28] sm:$0xff]  ;;  %s1909_s28 = sshll.u32 (%p2460_p11), %s2429_s22, 4 }
  0x65   : > { %v1924_v54 = vld [vmem:[%s2552_s8 + $0x30] sm:$0xff]  ;;  %v1925_v55 = vld [vmem:[%s2552_s8 + $0x38] sm:$0xff]  ;;  %v342_v56 = vld [vmem:[#allocation7] sm:$0x3]  ;;  %s1613_s14 = ssub.s32 (%p2460_p11), 63, %s1909_s28 }
  0x66   : > { %v2574_v57 = vperm.slane %v342_v56, 0  ;;  %v2576_v58 = vperm.slane %v342_v56, 1  ;;  %v1949_v63 = vld [vmem:[#allocation8 + $0x38] sm:$0xff]  ;;  %v1948_v4 = vld [vmem:[#allocation8 + $0x30] sm:$0xff]  ;;  %v1947_v13 = vld [vmem:[#allocation8 + $0x28] sm:$0xff]  ;;  %p1614_p6 = scmp.lt.s32.totalorder (%p2460_p11), %s1613_s14, 16 }
  0x67   : > { %479 = vmatpush.bf16.msra.mxu0 %v1815_v22  ;;  %v1957_v0 = vld [vmem:[#allocation8 + $0x78] sm:$0xff]  ;;  %1442 = vmatpush.bf16.msra.mxu2 %v1949_v63  ;;  %v1956_v5 = vld [vmem:[#allocation8 + $0x70] sm:$0xff]  ;;  %v1955_v14 = vld [vmem:[#allocation8 + $0x68] sm:$0xff] }
  0x68   : > { %528 = vmatpush.bf16.msra.mxu1 %v1819_v23  ;;  %1491 = vmatpush.bf16.msra.mxu3 %v1957_v0  ;;  %v1946_v22 = vld [vmem:[#allocation8 + $0x20] sm:$0xff]  ;;  %v1943_v0 = vld [vmem:[#allocation8 + $0x8] sm:$0xff] }
  0x69   : > { %v1954_v23 = vld [vmem:[#allocation8 + $0x60] sm:$0xff] }
  0x6b   : > { %480 = vmatpush.bf16.msra.mxu0 %v1807_v28  ;;  %1443 = vmatpush.bf16.msra.mxu2 %v1948_v4 }
  0x6c   : > { %529 = vmatpush.bf16.msra.mxu1 %v1811_v29  ;;  %1492 = vmatpush.bf16.msra.mxu3 %v1956_v5 }
  0x6f   : > { %481 = vmatpush.bf16.msra.mxu0 %v1799_v34  ;;  %1444 = vmatpush.bf16.msra.mxu2 %v1947_v13  ;;  %v1945_v34 = vld [vmem:[#allocation8 + $0x18] sm:$0xff] }
  0x70   : > { %530 = vmatpush.bf16.msra.mxu1 %v1803_v35  ;;  %1493 = vmatpush.bf16.msra.mxu3 %v1955_v14  ;;  %v1953_v35 = vld [vmem:[#allocation8 + $0x58] sm:$0xff] }
  0x73   : > { %482 = vmatpush.bf16.msra.mxu0 %v1791_v40  ;;  %1445 = vmatpush.bf16.msra.mxu2 %v1946_v22  ;;  %v1950_v22 = vld [vmem:[#allocation8 + $0x40] sm:$0xff] }
  0x74   : > { %531 = vmatpush.bf16.msra.mxu1 %v1795_v41  ;;  %1494 = vmatpush.bf16.msra.mxu3 %v1954_v23 }
  0x77   : > { %483 = vmatpush.bf16.msra.mxu0 %v1783_v46  ;;  %1446 = vmatpush.bf16.msra.mxu2 %v1945_v34  ;;  %v1944_v46 = vld [vmem:[#allocation8 + $0x10] sm:$0xff] }
  0x78   : > { %532 = vmatpush.bf16.msra.mxu1 %v1787_v47  ;;  %1495 = vmatpush.bf16.msra.mxu3 %v1953_v35  ;;  %v1952_v47 = vld [vmem:[#allocation8 + $0x50] sm:$0xff] }
  0x7a   : > { %484 = vmatmul.bf16.vlgmr.msra.gmra.mxu0 %v1918_v48 }
  0x7b   : > { %533 = vmatmul.bf16.vlgmr.msra.gmra.mxu1 %v1918_v48  ;;  %1447 = vmatpush.bf16.msra.mxu2 %v1944_v46 }
  0x7c   : > { %1496 = vmatpush.bf16.msra.mxu3 %v1952_v47 }
  0x7f   : > { %1448 = vmatpush.bf16.msra.mxu2 %v1943_v0 }
  0x8a   : > { %489 = vmatmul.bf16.gmra.mxu0 %v1919_v49 }
  0x8b   : > { %538 = vmatmul.bf16.gmra.mxu1 %v1919_v49 }
  0x9a   : > { %494 = vmatmul.bf16.gmra.mxu0 %v1920_v50 }
  0x9b   : > { %543 = vmatmul.bf16.gmra.mxu1 %v1920_v50 }
  0xaa   : > { %499 = vmatmul.bf16.gmra.mxu0 %v1921_v51 }
  0xab   : > { %548 = vmatmul.bf16.gmra.mxu1 %v1921_v51 }
  0xba   : > { %504 = vmatmul.bf16.gmra.mxu0 %v1922_v52 }
  0xbb   : > { %553 = vmatmul.bf16.gmra.mxu1 %v1922_v52 }
  0xca   : > { %509 = vmatmul.bf16.gmra.mxu0 %v1923_v53 }
  0xcb   : > { %558 = vmatmul.bf16.gmra.mxu1 %v1923_v53 }
  0xda   : > { %514 = vmatmul.bf16.gmra.mxu0 %v1924_v54 }
  0xdb   : > { %563 = vmatmul.bf16.gmra.mxu1 %v1924_v54 }
  0xea   : > { %519 = vmatmul.bf16.gmra.mxu0 %v1925_v55 }
  0xeb   : > { %568 = vmatmul.bf16.gmra.mxu1 %v1925_v55 }
  0xf7   : > { %v485_v59 = vpop.f32.mrf.mxu0 }
  0xf8   : > { %v486_v60 = vadd.f32 %v485_v59, %v2574_v57  ;;  %v534_v61 = vpop.f32.mrf.mxu1 }
  0xf9   : > { %v535_v62 = vadd.f32 %v534_v61, %v2576_v58 }
  0xfb   : > { %v574_v1 = vpack.c.bf16 %v535_v62, %v486_v60 }
  0xfd   : > { %v2580_v2 = vunpack.c.l.bf16 %v574_v1  ;;  %v2582_v3 = vunpack.c.h.bf16 %v574_v1  ;;  %v1951_v1 = vld [vmem:[#allocation8 + $0x48] sm:$0xff] }
  0xfe   : > { %1497 = vmatpush.bf16.msra.mxu3 %v1951_v1 }
  0xff   : > { %v670_v6 = vmul.f32 0.044677734, %v2580_v2  ;;  %v671_v7 = vmul.f32 0.044677734, %v2582_v3  ;;  %v487_v8 = vpop.f32.mrf.mxu0  ;;  %v623_v14 = vmul.f32 0.5, %v2582_v3 }
 0x100   : > { %v488_v9 = vadd.f32 %v487_v8, %v2574_v57  ;;  %v536_v10 = vpop.f32.mrf.mxu1 }
 0x101   : > { %v702_v11 = vpack.c.bf16 %v671_v7, %v670_v6  ;;  %v537_v12 = vadd.f32 %v536_v10, %v2576_v58  ;;  %v622_v10 = vmul.f32 0.5, %v2580_v2 }
 0x102   : > { %1498 = vmatpush.bf16.msra.mxu3 %v1950_v22 }
 0x103   : > { %v718_v15 = vunpack.c.l.bf16 %v702_v11  ;;  %v719_v16 = vunpack.c.h.bf16 %v702_v11  ;;  %v575_v17 = vpack.c.bf16 %v537_v12, %v488_v9 }
 0x105   : > { %v750_v18 = vmul.f32 %v718_v15, %v2580_v2  ;;  %v751_v19 = vmul.f32 %v719_v16, %v2582_v3  ;;  %v2590_v20 = vunpack.c.l.bf16 %v575_v17  ;;  %v2592_v21 = vunpack.c.h.bf16 %v575_v17 }
 0x107   : > { %v782_v24 = vpack.c.bf16 %v751_v19, %v750_v18  ;;  %v672_v25 = vmul.f32 0.044677734, %v2590_v20  ;;  %v673_v26 = vmul.f32 0.044677734, %v2592_v21  ;;  %v490_v27 = vpop.f32.mrf.mxu0  ;;  %v1942_v19 = vld [vmem:[#allocation8] sm:$0xff] }
 0x108   : > { %v491_v28 = vadd.f32 %v490_v27, %v2574_v57  ;;  %v539_v29 = vpop.f32.mrf.mxu1  ;;  %1449 = vmatpush.bf16.msra.mxu2 %v1942_v19 }
 0x109   : > { %v798_v30 = vunpack.c.l.bf16 %v782_v24  ;;  %v799_v31 = vunpack.c.h.bf16 %v782_v24  ;;  %v703_v32 = vpack.c.bf16 %v673_v26, %v672_v25  ;;  %v540_v33 = vadd.f32 %v539_v29, %v2576_v58 }
 0x10b   : > { %v830_v36 = vmul.f32 %v798_v30, %v2580_v2  ;;  %v831_v37 = vmul.f32 %v799_v31, %v2582_v3  ;;  %v720_v38 = vunpack.c.l.bf16 %v703_v32  ;;  %v721_v39 = vunpack.c.h.bf16 %v703_v32 }
 0x10c   : > { %v576_v40 = vpack.c.bf16 %v540_v33, %v491_v28 }
 0x10d   : > { %v862_v41 = vpack.c.bf16 %v831_v37, %v830_v36  ;;  %v752_v42 = vmul.f32 %v720_v38, %v2590_v20  ;;  %v753_v43 = vmul.f32 %v721_v39, %v2592_v21 }
 0x10e   : > { %v2602_v44 = vunpack.c.l.bf16 %v576_v40  ;;  %v2604_v45 = vunpack.c.h.bf16 %v576_v40  ;;  %v2628_v40 = vpack.c.bf16 %v623_v14, %v622_v10 }
 0x10f   : > { %v878_v48 = vunpack.c.l.bf16 %v862_v41  ;;  %v879_v49 = vunpack.c.h.bf16 %v862_v41  ;;  %v783_v50 = vpack.c.bf16 %v753_v43, %v752_v42  ;;  %v492_v51 = vpop.f32.mrf.mxu0 }
 0x110   : > { %v674_v52 = vmul.f32 0.044677734, %v2602_v44  ;;  %v675_v53 = vmul.f32 0.044677734, %v2604_v45  ;;  %v493_v54 = vadd.f32 %v492_v51, %v2574_v57  ;;  %v541_v55 = vpop.f32.mrf.mxu1 }
 0x111   : > { %v910_v56 = vadd.f32 %v878_v48, %v2580_v2  ;;  %v911_v59 = vadd.f32 %v879_v49, %v2582_v3  ;;  %v800_v60 = vunpack.c.l.bf16 %v783_v50  ;;  %v801_v61 = vunpack.c.h.bf16 %v783_v50 }
 0x112   : > { %v704_v62 = vpack.c.bf16 %v675_v53, %v674_v52  ;;  %v542_v63 = vadd.f32 %v541_v55, %v2576_v58 }
 0x113   : > { %v942_v4 = vpack.c.bf16 %v911_v59, %v910_v56  ;;  %v832_v5 = vmul.f32 %v800_v60, %v2590_v20  ;;  %v833_v6 = vmul.f32 %v801_v61, %v2592_v21 }
 0x114   : > { %v722_v7 = vunpack.c.l.bf16 %v704_v62  ;;  %v723_v8 = vunpack.c.h.bf16 %v704_v62  ;;  %v577_v9 = vpack.c.bf16 %v542_v63, %v493_v54 }
 0x115   : > { %v958_v11 = vunpack.c.l.bf16 %v942_v4  ;;  %v959_v12 = vunpack.c.h.bf16 %v942_v4  ;;  %v863_v13 = vpack.c.bf16 %v833_v6, %v832_v5 }
 0x116   : > { %v754_v15 = vmul.f32 %v722_v7, %v2602_v44  ;;  %v755_v16 = vmul.f32 %v723_v8, %v2604_v45  ;;  %v2618_v17 = vunpack.c.l.bf16 %v577_v9  ;;  %v2620_v18 = vunpack.c.h.bf16 %v577_v9 }
 0x117   : > { %v990_v23 = vmul.f32 0.796875, %v958_v11  ;;  %v991_v24 = vmul.f32 0.796875, %v959_v12  ;;  %v880_v25 = vunpack.c.l.bf16 %v863_v13  ;;  %v881_v26 = vunpack.c.h.bf16 %v863_v13  ;;  %v495_v2 = vpop.f32.mrf.mxu0 }
 0x118   : > { %v784_v27 = vpack.c.bf16 %v755_v16, %v754_v15  ;;  %v676_v28 = vmul.f32 0.044677734, %v2618_v17  ;;  %v677_v3 = vmul.f32 0.044677734, %v2620_v18  ;;  %v496_v29 = vadd.f32 %v495_v2, %v2574_v57  ;;  %v544_v30 = vpop.f32.mrf.mxu1 }
 0x119   : > { %v912_v31 = vadd.f32 %v880_v25, %v2590_v20  ;;  %v913_v32 = vadd.f32 %v881_v26, %v2592_v21  ;;  %v545_v33 = vadd.f32 %v544_v30, %v2576_v58  ;;  %v1022_v34 = vpack.c.bf16 %v991_v24, %v990_v23 }
 0x11a   : > { %v802_v35 = vunpack.c.l.bf16 %v784_v27  ;;  %v803_v36 = vunpack.c.h.bf16 %v784_v27  ;;  %v705_v37 = vpack.c.bf16 %v677_v3, %v676_v28  ;;  %v624_v8 = vmul.f32 0.5, %v2590_v20 }
 0x11b   : > { %v943_v38 = vpack.c.bf16 %v913_v32, %v912_v31  ;;  %v578_v39 = vpack.c.bf16 %v545_v33, %v496_v29  ;;  %v1038_v41 = vunpack.c.l.bf16 %v1022_v34  ;;  %v1039_v55 = vunpack.c.h.bf16 %v1022_v34 }
 0x11c   : > { %v834_v42 = vmul.f32 %v802_v35, %v2602_v44  ;;  %v835_v43 = vmul.f32 %v803_v36, %v2604_v45  ;;  %v724_v46 = vunpack.c.l.bf16 %v705_v37  ;;  %v725_v47 = vunpack.c.h.bf16 %v705_v37 }
 0x11d   : > { %v960_v48 = vunpack.c.l.bf16 %v943_v38  ;;  %v961_v49 = vunpack.c.h.bf16 %v943_v38  ;;  %v2632_v50 = vunpack.c.l.bf16 %v578_v39  ;;  %v2634_v51 = vunpack.c.h.bf16 %v578_v39 }
 0x11e   : > { %v864_v52 = vpack.c.bf16 %v835_v43, %v834_v42  ;;  %v756_v53 = vmul.f32 %v724_v46, %v2618_v17  ;;  %v757_v54 = vmul.f32 %v725_v47, %v2620_v18  ;;  %v625_v12 = vmul.f32 0.5, %v2592_v21 }
 0x11f   : > { %v992_v56 = vmul.f32 0.796875, %v960_v48  ;;  %v993_v59 = vmul.f32 0.796875, %v961_v49  ;;  %v678_v60 = vmul.f32 0.044677734, %v2632_v50  ;;  %v679_v61 = vmul.f32 0.044677734, %v2634_v51  ;;  %v497_v62 = vpop.f32.mrf.mxu0 }
 0x120   : > { %v882_v63 = vunpack.c.l.bf16 %v864_v52  ;;  %v883_v0 = vunpack.c.h.bf16 %v864_v52  ;;  %v785_v1 = vpack.c.bf16 %v757_v54, %v756_v53  ;;  %v498_v4 = vadd.f32 %v497_v62, %v2574_v57  ;;  %v546_v5 = vpop.f32.mrf.mxu1 }
 0x121   : > { %v706_v6 = vpack.c.bf16 %v679_v61, %v678_v60  ;;  %v547_v7 = vadd.f32 %v546_v5, %v2576_v58  ;;  %v1023_v9 = vpack.c.bf16 %v993_v59, %v992_v56  ;;  %2085 = vtanh.f32 %v1038_v41 }
 0x122   : > { %v914_v10 = vadd.f32 %v882_v63, %v2602_v44  ;;  %v915_v11 = vadd.f32 %v883_v0, %v2604_v45  ;;  %v804_v19 = vunpack.c.l.bf16 %v785_v1  ;;  %v805_v22 = vunpack.c.h.bf16 %v785_v1 }
 0x123   : > { %v726_v13 = vunpack.c.l.bf16 %v706_v6  ;;  %v727_v14 = vunpack.c.h.bf16 %v706_v6  ;;  %v579_v15 = vpack.c.bf16 %v547_v7, %v498_v4  ;;  %v1040_v16 = vunpack.c.l.bf16 %v1023_v9 }
 0x124   : > { %v1041_v23 = vunpack.c.h.bf16 %v1023_v9  ;;  %2087 = vtanh.f32 %v1039_v55  ;;  %v2652_v2 = vpack.c.bf16 %v915_v11, %v914_v10  ;;  %v1198_v21 = vunpack.c.l.bf16 %v2628_v40 }
 0x125   : > { %v758_v24 = vmul.f32 %v726_v13, %v2632_v50  ;;  %v759_v20 = vmul.f32 %v727_v14, %v2634_v51  ;;  %v2648_v25 = vunpack.c.l.bf16 %v579_v15  ;;  %v2650_v26 = vunpack.c.h.bf16 %v579_v15 }
 0x126   : > { %2089 = vtanh.f32 %v1040_v16  ;;  %v836_v31 = vmul.f32 %v804_v19, %v2618_v17  ;;  %v837_v32 = vmul.f32 %v805_v22, %v2620_v18  ;;  %v2659_v34 = vpack.c.bf16 %v625_v12, %v624_v8 }
 0x127   : > { %v786_v27 = vpack.c.bf16 %v759_v20, %v758_v24  ;;  %v680_v28 = vmul.f32 0.044677734, %v2648_v25  ;;  %v681_v3 = vmul.f32 0.044677734, %v2650_v26  ;;  %v500_v29 = vpop.f32.mrf.mxu0  ;;  %v2086_v30 = vpop.eup %2085  ;;  %2091 = vtanh.f32 %v1041_v23 }
 0x128   : > { %v549_v33 = vpop.f32.mrf.mxu1  ;;  %v501_v38 = vadd.f32 %v500_v29, %v2574_v57  ;;  %v962_v41 = vunpack.c.l.bf16 %v2652_v2  ;;  %v626_v43 = vmul.f32 0.5, %v2602_v44  ;;  %v627_v46 = vmul.f32 0.5, %v2604_v45 }
 0x129   : > { %v806_v35 = vunpack.c.l.bf16 %v786_v27  ;;  %v807_v36 = vunpack.c.h.bf16 %v786_v27  ;;  %v707_v37 = vpack.c.bf16 %v681_v3, %v680_v28  ;;  %v550_v42 = vadd.f32 %v549_v33, %v2576_v58 }
 0x12a   : > { %v2088_v39 = vpop.eup %2087  ;;  %v865_v53 = vpack.c.bf16 %v837_v32, %v836_v31  ;;  %v1200_v55 = vunpack.c.l.bf16 %v2659_v34  ;;  %v1199_v56 = vunpack.c.h.bf16 %v2628_v40  ;;  %v1201_v45 = vunpack.c.h.bf16 %v2659_v34 }
 0x12b   : > { %v838_v47 = vmul.f32 %v806_v35, %v2632_v50  ;;  %v839_v48 = vmul.f32 %v807_v36, %v2634_v51  ;;  %v728_v49 = vunpack.c.l.bf16 %v707_v37  ;;  %v729_v52 = vunpack.c.h.bf16 %v707_v37 }
 0x12c   : > { %v580_v54 = vpack.c.bf16 %v550_v42, %v501_v38  ;;  %v2090_v59 = vpop.eup %2089  ;;  %v1102_v1 = vpack.c.bf16 %v2088_v39, %v2086_v30  ;;  %v2677_v4 = vpack.c.bf16 %v627_v46, %v626_v43  ;;  %v963_v5 = vunpack.c.h.bf16 %v2652_v2 }
 0x12d   : > { %v866_v60 = vpack.c.bf16 %v839_v48, %v838_v47  ;;  %v760_v61 = vmul.f32 %v728_v49, %v2648_v25  ;;  %v761_v44 = vmul.f32 %v729_v52, %v2650_v26  ;;  %v2092_v62 = vpop.eup %2091  ;;  %v2680_v6 = vmul.f32 0.796875, %v962_v41 }
 0x12e   : > { %v2673_v63 = vunpack.c.l.bf16 %v580_v54  ;;  %v2675_v0 = vunpack.c.h.bf16 %v580_v54  ;;  %v2683_v9 = vmul.f32 0.5, %v2618_v17  ;;  %v884_v10 = vunpack.c.l.bf16 %v865_v53 }
 0x12f   : > { %v787_v7 = vpack.c.bf16 %v761_v44, %v760_v61  ;;  %v502_v8 = vpop.f32.mrf.mxu0  ;;  %v885_v11 = vunpack.c.h.bf16 %v865_v53  ;;  %v886_v15 = vunpack.c.l.bf16 %v866_v60  ;;  %v1103_v22 = vpack.c.bf16 %v2092_v62, %v2090_v59 }
 0x130   : > { %v682_v12 = vmul.f32 0.044677734, %v2673_v63  ;;  %v683_v13 = vmul.f32 0.044677734, %v2675_v0  ;;  %v551_v14 = vpop.f32.mrf.mxu1  ;;  %v503_v24 = vadd.f32 %v502_v8, %v2574_v57  ;;  %v1118_v2 = vunpack.c.l.bf16 %v1102_v1 }
 0x131   : > { %v808_v16 = vunpack.c.l.bf16 %v787_v7  ;;  %v809_v19 = vunpack.c.h.bf16 %v787_v7  ;;  %v552_v20 = vadd.f32 %v551_v14, %v2576_v58  ;;  %v887_v27 = vunpack.c.h.bf16 %v866_v60 }
 0x132   : > { %v708_v23 = vpack.c.bf16 %v683_v13, %v682_v12  ;;  %v1119_v29 = vunpack.c.h.bf16 %v1102_v1  ;;  %v916_v30 = vadd.f32 %v884_v10, %v2618_v17  ;;  %v917_v35 = vadd.f32 %v885_v11, %v2620_v18 }
 0x133   : > { %v840_v28 = vmul.f32 %v808_v16, %v2648_v25  ;;  %v841_v3 = vmul.f32 %v809_v19, %v2650_v26  ;;  %v581_v33 = vpack.c.bf16 %v552_v20, %v503_v24  ;;  %v918_v36 = vadd.f32 %v886_v15, %v2632_v50 }
 0x134   : > { %v730_v31 = vunpack.c.l.bf16 %v708_v23  ;;  %v731_v32 = vunpack.c.h.bf16 %v708_v23  ;;  %v1120_v37 = vunpack.c.l.bf16 %v1103_v22  ;;  %v1121_v38 = vunpack.c.h.bf16 %v1103_v22 }
 0x135   : > { %v2696_v42 = vunpack.c.l.bf16 %v581_v33  ;;  %v2698_v43 = vunpack.c.h.bf16 %v581_v33  ;;  %v919_v46 = vadd.f32 %v887_v27, %v2634_v51  ;;  %v867_v17 = vpack.c.bf16 %v841_v3, %v840_v28 }
 0x136   : > { %v762_v39 = vmul.f32 %v730_v31, %v2673_v63  ;;  %v763_v41 = vmul.f32 %v731_v32, %v2675_v0  ;;  %v1150_v48 = vadd.f32 1.0, %v1118_v2  ;;  %v1151_v49 = vadd.f32 1.0, %v1119_v29 }
 0x137   : > { %v505_v47 = vpop.f32.mrf.mxu0  ;;  %v684_v53 = vmul.f32 0.044677734, %v2696_v42  ;;  %v685_v54 = vmul.f32 0.044677734, %v2698_v43  ;;  %v2704_v61 = vmul.f32 0.796875, %v963_v5  ;;  %v945_v44 = vpack.c.bf16 %v917_v35, %v916_v30 }
 0x138   : > { %v788_v52 = vpack.c.bf16 %v763_v41, %v762_v39  ;;  %v506_v59 = vadd.f32 %v505_v47, %v2574_v57  ;;  %v554_v60 = vpop.f32.mrf.mxu1  ;;  %v1152_v1 = vadd.f32 1.0, %v1120_v37  ;;  %v1153_v11 = vadd.f32 1.0, %v1121_v38 }
 0x139   : > { %v555_v62 = vadd.f32 %v554_v60, %v2576_v58  ;;  %v709_v10 = vpack.c.bf16 %v685_v54, %v684_v53  ;;  %v2707_v12 = vpack.c.bf16 %v919_v46, %v918_v36  ;;  %v888_v13 = vunpack.c.l.bf16 %v867_v17 }
 0x13a   : > { %v810_v7 = vunpack.c.l.bf16 %v788_v52  ;;  %v811_v8 = vunpack.c.h.bf16 %v788_v52  ;;  %v1182_v15 = vpack.c.bf16 %v1151_v49, %v1150_v48  ;;  %v889_v23 = vunpack.c.h.bf16 %v867_v17 }
 0x13b   : > { %v582_v14 = vpack.c.bf16 %v555_v62, %v506_v59  ;;  %v732_v22 = vunpack.c.l.bf16 %v709_v10  ;;  %v733_v5 = vunpack.c.h.bf16 %v709_v10  ;;  %v2716_v2 = vmul.f32 0.5, %v2620_v18 }
 0x13c   : > { %v842_v16 = vmul.f32 %v810_v7, %v2673_v63  ;;  %v843_v19 = vmul.f32 %v811_v8, %v2675_v0  ;;  %v1183_v29 = vpack.c.bf16 %v1153_v11, %v1152_v1  ;;  %v964_v30 = vunpack.c.l.bf16 %v945_v44 }
 0x13d   : > { %v2711_v24 = vunpack.c.l.bf16 %v582_v14  ;;  %v2713_v20 = vunpack.c.h.bf16 %v582_v14  ;;  %v764_v28 = vmul.f32 %v732_v22, %v2696_v42  ;;  %v765_v3 = vmul.f32 %v733_v5, %v2698_v43 }
 0x13e   : > { %v868_v27 = vpack.c.bf16 %v843_v19, %v842_v16  ;;  %v965_v31 = vunpack.c.h.bf16 %v945_v44  ;;  %v966_v36 = vunpack.c.l.bf16 %v2707_v12  ;;  %v920_v37 = vadd.f32 %v888_v13, %v2648_v25 }
 0x13f   : > { %v686_v32 = vmul.f32 0.044677734, %v2711_v24  ;;  %v687_v33 = vmul.f32 0.044677734, %v2713_v20  ;;  %v507_v35 = vpop.f32.mrf.mxu0  ;;  %v789_v38 = vpack.c.bf16 %v765_v3, %v764_v28  ;;  %v1230_v18 = vunpack.c.l.bf16 %v1182_v15 }
 0x140   : > { %v556_v39 = vpop.f32.mrf.mxu1  ;;  %v1232_v46 = vunpack.c.l.bf16 %v1183_v29  ;;  %v1231_v17 = vunpack.c.h.bf16 %v1182_v15  ;;  %v1233_v47 = vunpack.c.h.bf16 %v1183_v29  ;;  %v921_v48 = vadd.f32 %v889_v23, %v2650_v26 }
 0x141   : > { %v710_v41 = vpack.c.bf16 %v687_v33, %v686_v32  ;;  %v890_v49 = vunpack.c.l.bf16 %v868_v27  ;;  %v812_v52 = vunpack.c.l.bf16 %v789_v38  ;;  %v813_v53 = vunpack.c.h.bf16 %v789_v38 }
 0x142   : > { %v1262_v60 = vmul.f32 %v1230_v18, %v1198_v21  ;;  %v1264_v44 = vmul.f32 %v1232_v46, %v1200_v55  ;;  %v891_v62 = vunpack.c.h.bf16 %v868_v27  ;;  %v1263_v8 = vmul.f32 %v1231_v17, %v1199_v56 }
 0x143   : > { %v734_v54 = vunpack.c.l.bf16 %v710_v41  ;;  %v735_v59 = vunpack.c.h.bf16 %v710_v41  ;;  %v844_v1 = vmul.f32 %v812_v52, %v2696_v42  ;;  %v845_v7 = vmul.f32 %v813_v53, %v2698_v43 }
 0x144   : > { %v1294_v13 = vpack.c.bf16 %v1264_v44, %v1262_v60  ;;  %v1265_v14 = vmul.f32 %v1233_v47, %v1201_v45  ;;  %v996_v21 = vmul.f32 0.796875, %v964_v30  ;;  %v997_v15 = vmul.f32 0.796875, %v965_v31 }
 0x145   : > { %v766_v10 = vmul.f32 %v734_v54, %v2711_v24  ;;  %v767_v11 = vmul.f32 %v735_v59, %v2713_v20  ;;  %v869_v16 = vpack.c.bf16 %v845_v7, %v844_v1  ;;  %v508_v55 = vadd.f32 %v507_v35, %v2574_v57 }
 0x146   : > { %v967_v19 = vunpack.c.h.bf16 %v2707_v12  ;;  %1450 = vmatmul.bf16.vlgmr.msra.gmra.mxu2 %v1294_v13  ;;  %v1295_v5 = vpack.c.bf16 %v1265_v14, %v1263_v8  ;;  %v557_v40 = vadd.f32 %v556_v39, %v2576_v58  ;;  %v2740_v23 = vmul.f32 0.796875, %v966_v36 }
 0x147   : > { %v790_v22 = vpack.c.bf16 %v767_v11, %v766_v10  ;;  %v510_v56 = vpop.f32.mrf.mxu0  ;;  %v2742_v27 = vpack.c.bf16 %v921_v48, %v920_v37  ;;  %v922_v34 = vadd.f32 %v890_v49, %v2673_v63  ;;  %v923_v45 = vadd.f32 %v891_v62, %v2675_v0 }
 0x148   : > { %v559_v28 = vpop.f32.mrf.mxu1  ;;  %1499 = vmatmul.bf16.vlgmr.msra.gmra.mxu3 %v1295_v5  ;;  %v583_v30 = vpack.c.bf16 %v557_v40, %v508_v55  ;;  %v511_v12 = vadd.f32 %v510_v56, %v2574_v57  ;;  %v892_v31 = vunpack.c.l.bf16 %v869_v16  ;;  %v893_v32 = vunpack.c.h.bf16 %v869_v16 }
 0x149   : > { %v814_v3 = vunpack.c.l.bf16 %v790_v22  ;;  %v815_v29 = vunpack.c.h.bf16 %v790_v22  ;;  %v560_v33 = vadd.f32 %v559_v28, %v2576_v58  ;;  %v1024_v35 = vpack.c.bf16 %v2704_v61, %v2680_v6 }
 0x14a   : > { %v2752_v38 = vunpack.c.l.bf16 %v583_v30  ;;  %v2754_v18 = vunpack.c.h.bf16 %v583_v30  ;;  %v2756_v39 = vmul.f32 0.796875, %v967_v19  ;;  %v2760_v46 = vpack.c.bf16 %v2716_v2, %v2683_v9 }
 0x14b   : > { %v846_v36 = vmul.f32 %v814_v3, %v2711_v24  ;;  %v847_v37 = vmul.f32 %v815_v29, %v2713_v20  ;;  %v584_v41 = vpack.c.bf16 %v560_v33, %v511_v12  ;;  %v1025_v17 = vpack.c.bf16 %v997_v15, %v996_v21 }
 0x14c   : > { %v968_v47 = vunpack.c.l.bf16 %v2742_v27  ;;  %v688_v6 = vmul.f32 0.044677734, %v2752_v38  ;;  %v689_v61 = vmul.f32 0.044677734, %v2754_v18  ;;  %v948_v49 = vpack.c.bf16 %v923_v45, %v922_v34 }
 0x14d   : > { %v870_v48 = vpack.c.bf16 %v847_v37, %v846_v36  ;;  %v2765_v52 = vunpack.c.l.bf16 %v584_v41  ;;  %v2767_v53 = vunpack.c.h.bf16 %v584_v41  ;;  %v1042_v54 = vunpack.c.l.bf16 %v1024_v35 }
 0x14e   : > { %v924_v59 = vadd.f32 %v892_v31, %v2696_v42  ;;  %v925_v60 = vadd.f32 %v893_v32, %v2698_v43  ;;  %v711_v9 = vpack.c.bf16 %v689_v61, %v688_v6  ;;  %v1043_v2 = vunpack.c.h.bf16 %v1024_v35 }
 0x14f   : > { %v894_v44 = vunpack.c.l.bf16 %v870_v48  ;;  %v690_v62 = vmul.f32 0.044677734, %v2765_v52  ;;  %v691_v1 = vmul.f32 0.044677734, %v2767_v53  ;;  %v1044_v7 = vunpack.c.l.bf16 %v1025_v17  ;;  %v512_v14 = vpop.f32.mrf.mxu0 }
 0x150   : > { %v895_v8 = vunpack.c.h.bf16 %v870_v48  ;;  %v736_v10 = vunpack.c.l.bf16 %v711_v9  ;;  %v737_v11 = vunpack.c.h.bf16 %v711_v9  ;;  %v1045_v13 = vunpack.c.h.bf16 %v1025_v17  ;;  %v561_v21 = vpop.f32.mrf.mxu1 }
 0x151   : > { %v969_v15 = vunpack.c.h.bf16 %v2742_v27  ;;  %v970_v16 = vunpack.c.l.bf16 %v948_v49  ;;  %v712_v55 = vpack.c.bf16 %v691_v1, %v690_v62  ;;  %2093 = vtanh.f32 %v1042_v54 }
 0x152   : > { %v949_v19 = vpack.c.bf16 %v925_v60, %v924_v59  ;;  %v768_v22 = vmul.f32 %v736_v10, %v2752_v38  ;;  %v769_v5 = vmul.f32 %v737_v11, %v2754_v18  ;;  %2095 = vtanh.f32 %v1043_v2 }
 0x153   : > { %v971_v40 = vunpack.c.h.bf16 %v948_v49  ;;  %v738_v56 = vunpack.c.l.bf16 %v712_v55  ;;  %v739_v34 = vunpack.c.h.bf16 %v712_v55  ;;  %2097 = vtanh.f32 %v1044_v7 }
 0x154   : > { %v926_v45 = vadd.f32 %v894_v44, %v2711_v24  ;;  %v927_v28 = vadd.f32 %v895_v8, %v2713_v20  ;;  %v791_v3 = vpack.c.bf16 %v769_v5, %v768_v22  ;;  %2099 = vtanh.f32 %v1045_v13 }
 0x155   : > { %v2778_v27 = vmul.f32 0.796875, %v968_v47  ;;  %v770_v29 = vmul.f32 %v738_v56, %v2765_v52  ;;  %v771_v30 = vmul.f32 %v739_v34, %v2767_v53  ;;  %v513_v12 = vadd.f32 %v512_v14, %v2574_v57 }
 0x156   : > { %v972_v31 = vunpack.c.l.bf16 %v949_v19  ;;  %v973_v32 = vunpack.c.h.bf16 %v949_v19  ;;  %v816_v33 = vunpack.c.l.bf16 %v791_v3  ;;  %v817_v35 = vunpack.c.h.bf16 %v791_v3 }
 0x157   : > { %v2094_v36 = vpop.eup %2093  ;;  %v2783_v37 = vmul.f32 0.796875, %v969_v15  ;;  %v2785_v41 = vmul.f32 0.796875, %v970_v16  ;;  %v792_v17 = vpack.c.bf16 %v771_v30, %v770_v29  ;;  %v562_v48 = vadd.f32 %v561_v21, %v2576_v58  ;;  %v515_v11 = vpop.f32.mrf.mxu0 }
 0x158   : > { %v2096_v47 = vpop.eup %2095  ;;  %v2788_v6 = vmul.f32 0.796875, %v971_v40  ;;  %v2790_v61 = vpack.c.bf16 %v927_v28, %v926_v45  ;;  %v848_v49 = vmul.f32 %v816_v33, %v2752_v38  ;;  %v849_v54 = vmul.f32 %v817_v35, %v2754_v18  ;;  %v564_v13 = vpop.f32.mrf.mxu1 }
 0x159   : > { %v2098_v59 = vpop.eup %2097  ;;  %v818_v60 = vunpack.c.l.bf16 %v792_v17  ;;  %v819_v9 = vunpack.c.h.bf16 %v792_v17  ;;  %v1104_v2 = vpack.c.bf16 %v2096_v47, %v2094_v36  ;;  %v585_v44 = vpack.c.bf16 %v562_v48, %v513_v12 }
 0x15a   : > { %v2100_v62 = vpop.eup %2099  ;;  %v2794_v1 = vmul.f32 0.796875, %v972_v31  ;;  %v2796_v7 = vmul.f32 0.796875, %v973_v32  ;;  %v871_v8 = vpack.c.bf16 %v849_v54, %v848_v49  ;;  %v1202_v10 = vunpack.c.l.bf16 %v2677_v4 }
 0x15b   : > { %v850_v14 = vmul.f32 %v818_v60, %v2765_v52  ;;  %v851_v21 = vmul.f32 %v819_v9, %v2767_v53  ;;  %v1105_v15 = vpack.c.bf16 %v2100_v62, %v2098_v59  ;;  %v1122_v16 = vunpack.c.l.bf16 %v1104_v2 }
 0x15c   : > { %v1123_v55 = vunpack.c.h.bf16 %v1104_v2  ;;  %v1204_v19 = vunpack.c.l.bf16 %v2760_v46  ;;  %v1203_v22 = vunpack.c.h.bf16 %v2677_v4  ;;  %v2803_v5 = vunpack.c.l.bf16 %v585_v44 }
 0x15d   : > { %v974_v40 = vunpack.c.l.bf16 %v2790_v61  ;;  %v1124_v56 = vunpack.c.l.bf16 %v1105_v15  ;;  %v1125_v34 = vunpack.c.h.bf16 %v1105_v15  ;;  %v1154_v45 = vadd.f32 1.0, %v1122_v16 }
 0x15e   : > { %v896_v28 = vunpack.c.l.bf16 %v871_v8  ;;  %v897_v3 = vunpack.c.h.bf16 %v871_v8  ;;  %v1155_v29 = vadd.f32 1.0, %v1123_v55  ;;  %v2806_v30 = vunpack.c.h.bf16 %v585_v44 }
 0x15f   : > { %v975_v12 = vunpack.c.h.bf16 %v2790_v61  ;;  %v872_v31 = vpack.c.bf16 %v851_v21, %v850_v14  ;;  %v1156_v32 = vadd.f32 1.0, %v1124_v56  ;;  %v1157_v33 = vadd.f32 1.0, %v1125_v34 }
 0x160   : > { %v1184_v35 = vpack.c.bf16 %v1155_v29, %v1154_v45  ;;  %v1205_v4 = vunpack.c.h.bf16 %v2760_v46  ;;  %v692_v36 = vmul.f32 0.044677734, %v2803_v5  ;;  %v693_v17 = vmul.f32 0.044677734, %v2806_v30 }
 0x161   : > { %v1185_v48 = vpack.c.bf16 %v1157_v33, %v1156_v32  ;;  %v630_v47 = vmul.f32 0.5, %v2632_v50  ;;  %v631_v49 = vmul.f32 0.5, %v2634_v51  ;;  %v632_v54 = vmul.f32 0.5, %v2648_v25  ;;  %v517_v51 = vpop.f32.mrf.mxu0  ;;  %v566_v25 = vpop.f32.mrf.mxu1 }
 0x162   : > { %v928_v59 = vadd.f32 %v896_v28, %v2752_v38  ;;  %v929_v61 = vadd.f32 %v897_v3, %v2754_v18  ;;  %v1234_v60 = vunpack.c.l.bf16 %v1184_v35  ;;  %v1235_v9 = vunpack.c.h.bf16 %v1184_v35 }
 0x163   : > { %v898_v2 = vunpack.c.l.bf16 %v872_v31  ;;  %v1236_v44 = vunpack.c.l.bf16 %v1185_v48  ;;  %v1237_v46 = vunpack.c.h.bf16 %v1185_v48  ;;  %v713_v62 = vpack.c.bf16 %v693_v17, %v692_v36 }
 0x164   : > { %v899_v8 = vunpack.c.h.bf16 %v872_v31  ;;  %v516_v14 = vadd.f32 %v515_v11, %v2574_v57  ;;  %v633_v21 = vmul.f32 0.5, %v2650_v26  ;;  %v1026_v50 = vpack.c.bf16 %v2756_v39, %v2740_v23 }
 0x165   : > { %v1266_v15 = vmul.f32 %v1234_v60, %v1202_v10  ;;  %v1268_v16 = vmul.f32 %v1236_v44, %v1204_v19  ;;  %v1267_v55 = vmul.f32 %v1235_v9, %v1203_v22  ;;  %v1269_v56 = vmul.f32 %v1237_v46, %v1205_v4 }
 0x166   : > { %v740_v34 = vunpack.c.l.bf16 %v713_v62  ;;  %v741_v45 = vunpack.c.h.bf16 %v713_v62  ;;  %v565_v28 = vadd.f32 %v564_v13, %v2576_v58  ;;  %v1027_v3 = vpack.c.bf16 %v2783_v37, %v2778_v27 }
 0x167   : > { %v2824_v29 = vpack.c.bf16 %v929_v61, %v928_v59  ;;  %v930_v26 = vadd.f32 %v898_v2, %v2765_v52  ;;  %v1296_v11 = vpack.c.bf16 %v1268_v16, %v1266_v15  ;;  %v1297_v31 = vpack.c.bf16 %v1269_v56, %v1267_v55 }
 0x168   : > { %v772_v23 = vmul.f32 %v740_v34, %v2803_v5  ;;  %v773_v39 = vmul.f32 %v741_v45, %v2806_v30  ;;  %v586_v10 = vpack.c.bf16 %v565_v28, %v516_v14  ;;  %v1046_v19 = vunpack.c.l.bf16 %v1026_v50 }
 0x169   : > { %v931_v22 = vadd.f32 %v899_v8, %v2767_v53  ;;  %1455 = vmatmul.bf16.gmra.mxu2 %v1296_v11  ;;  %1504 = vmatmul.bf16.gmra.mxu3 %v1297_v31  ;;  %v1047_v13 = vunpack.c.h.bf16 %v1026_v50  ;;  %v1048_v32 = vunpack.c.l.bf16 %v1027_v3  ;;  %v1049_v33 = vunpack.c.h.bf16 %v1027_v3  ;;  %v520_v62 = vpop.f32.mrf.mxu0  ;;  %v569_v8 = vpop.f32.mrf.mxu1 }
 0x16a   : > { %v793_v27 = vpack.c.bf16 %v773_v39, %v772_v23  ;;  %v2830_v37 = vunpack.c.l.bf16 %v586_v10  ;;  %v2832_v35 = vunpack.c.h.bf16 %v586_v10  ;;  %2101 = vtanh.f32 %v1046_v19 }
 0x16b   : > { %v2834_v4 = vmul.f32 0.796875, %v974_v40  ;;  %v2836_v36 = vmul.f32 0.796875, %v975_v12  ;;  %v976_v17 = vunpack.c.l.bf16 %v2824_v29  ;;  %2103 = vtanh.f32 %v1047_v13 }
 0x16c   : > { %v820_v48 = vunpack.c.l.bf16 %v793_v27  ;;  %v821_v59 = vunpack.c.h.bf16 %v793_v27  ;;  %v694_v61 = vmul.f32 0.044677734, %v2830_v37  ;;  %v695_v60 = vmul.f32 0.044677734, %v2832_v35 }
 0x16d   : > { %v2841_v9 = vpack.c.bf16 %v931_v22, %v930_v26  ;;  %2105 = vtanh.f32 %v1048_v32  ;;  %v518_v2 = vadd.f32 %v517_v51, %v2574_v57  ;;  %v567_v44 = vadd.f32 %v566_v25, %v2576_v58 }
 0x16e   : > { %v714_v40 = vpack.c.bf16 %v695_v60, %v694_v61  ;;  %v2845_v46 = vpack.c.bf16 %v631_v49, %v630_v47  ;;  %v2847_v12 = vpack.c.bf16 %v633_v21, %v632_v54  ;;  %2107 = vtanh.f32 %v1049_v33 }
 0x16f   : > { %v977_v14 = vunpack.c.h.bf16 %v2824_v29  ;;  %v587_v50 = vpack.c.bf16 %v567_v44, %v518_v2  ;;  %v521_v15 = vadd.f32 %v520_v62, %v2574_v57  ;;  %v570_v16 = vadd.f32 %v569_v8, %v2576_v58 }
 0x170   : > { %v2102_v55 = vpop.eup %2101  ;;  %v852_v51 = vmul.f32 %v820_v48, %v2803_v5  ;;  %v853_v25 = vmul.f32 %v821_v59, %v2806_v30  ;;  %v742_v56 = vunpack.c.l.bf16 %v714_v40  ;;  %v743_v47 = vunpack.c.h.bf16 %v714_v40 }
 0x171   : > { %v2104_v49 = vpop.eup %2103  ;;  %v2854_v54 = vmul.f32 0.796875, %v976_v17  ;;  %v978_v21 = vunpack.c.l.bf16 %v2841_v9  ;;  %v2857_v34 = vunpack.c.l.bf16 %v587_v50  ;;  %v2859_v45 = vunpack.c.h.bf16 %v587_v50 }
 0x172   : > { %v979_v28 = vunpack.c.h.bf16 %v2841_v9  ;;  %v774_v3 = vmul.f32 %v742_v56, %v2830_v37  ;;  %v775_v26 = vmul.f32 %v743_v47, %v2832_v35  ;;  %v588_v11 = vpack.c.bf16 %v570_v16, %v521_v15 }
 0x173   : > { %v2106_v31 = vpop.eup %2105  ;;  %v1106_v23 = vpack.c.bf16 %v2104_v49, %v2102_v55  ;;  %v1206_v39 = vunpack.c.l.bf16 %v2845_v46  ;;  %v696_v10 = vmul.f32 0.044677734, %v2857_v34  ;;  %v697_v19 = vmul.f32 0.044677734, %v2859_v45 }
 0x174   : > { %v2108_v22 = vpop.eup %2107  ;;  %v873_v13 = vpack.c.bf16 %v853_v25, %v852_v51  ;;  %v794_v32 = vpack.c.bf16 %v775_v26, %v774_v3  ;;  %v1208_v33 = vunpack.c.l.bf16 %v2847_v12  ;;  %v1207_v27 = vunpack.c.h.bf16 %v2845_v46 }
 0x175   : > { %v1107_v17 = vpack.c.bf16 %v2108_v22, %v2106_v31  ;;  %v1126_v48 = vunpack.c.l.bf16 %v1106_v23  ;;  %v1127_v59 = vunpack.c.h.bf16 %v1106_v23  ;;  %v715_v61 = vpack.c.bf16 %v697_v19, %v696_v10 }
 0x176   : > { %v822_v60 = vunpack.c.l.bf16 %v794_v32  ;;  %v823_v2 = vunpack.c.h.bf16 %v794_v32  ;;  %v1209_v44 = vunpack.c.h.bf16 %v2847_v12  ;;  %v2870_v40 = vunpack.c.l.bf16 %v588_v11 }
 0x177   : > { %v1128_v62 = vunpack.c.l.bf16 %v1107_v17  ;;  %v1129_v8 = vunpack.c.h.bf16 %v1107_v17  ;;  %v1158_v50 = vadd.f32 1.0, %v1126_v48  ;;  %v1159_v15 = vadd.f32 1.0, %v1127_v59 }
 0x178   : > { %v900_v16 = vunpack.c.l.bf16 %v873_v13  ;;  %v854_v55 = vmul.f32 %v822_v60, %v2830_v37  ;;  %v855_v51 = vmul.f32 %v823_v2, %v2832_v35  ;;  %v2874_v46 = vunpack.c.h.bf16 %v588_v11 }
 0x179   : > { %v1160_v25 = vadd.f32 1.0, %v1128_v62  ;;  %v1161_v56 = vadd.f32 1.0, %v1129_v8  ;;  %v1186_v47 = vpack.c.bf16 %v1159_v15, %v1158_v50  ;;  %v744_v49 = vunpack.c.l.bf16 %v715_v61 }
 0x17a   : > { %v901_v3 = vunpack.c.h.bf16 %v873_v13  ;;  %v874_v26 = vpack.c.bf16 %v855_v51, %v854_v55  ;;  %v745_v12 = vunpack.c.h.bf16 %v715_v61  ;;  %v698_v31 = vmul.f32 0.044677734, %v2870_v40 }
 0x17b   : > { %v1187_v23 = vpack.c.bf16 %v1161_v56, %v1160_v25  ;;  %v1238_v10 = vunpack.c.l.bf16 %v1186_v47  ;;  %v1239_v19 = vunpack.c.h.bf16 %v1186_v47  ;;  %v776_v22 = vmul.f32 %v744_v49, %v2857_v34 }
 0x17c   : > { %v777_v32 = vmul.f32 %v745_v12, %v2859_v45  ;;  %v699_v17 = vmul.f32 0.044677734, %v2874_v46  ;;  %v634_v11 = vmul.f32 0.5, %v2673_v63  ;;  %v635_v48 = vmul.f32 0.5, %v2675_v0 }
 0x17d   : > { %v932_v59 = vadd.f32 %v900_v16, %v2803_v5  ;;  %v1240_v13 = vunpack.c.l.bf16 %v1187_v23  ;;  %v1241_v60 = vunpack.c.h.bf16 %v1187_v23  ;;  %v636_v61 = vmul.f32 0.5, %v2696_v42 }
 0x17e   : > { %v933_v2 = vadd.f32 %v901_v3, %v2806_v30  ;;  %v902_v62 = vunpack.c.l.bf16 %v874_v26  ;;  %v795_v8 = vpack.c.bf16 %v777_v32, %v776_v22  ;;  %v716_v50 = vpack.c.bf16 %v699_v17, %v698_v31 }
 0x17f   : > { %v1270_v15 = vmul.f32 %v1238_v10, %v1206_v39  ;;  %v1272_v55 = vmul.f32 %v1240_v13, %v1208_v33  ;;  %v1271_v51 = vmul.f32 %v1239_v19, %v1207_v27  ;;  %v1273_v25 = vmul.f32 %v1241_v60, %v1209_v44  ;;  %v522_v60 = vpop.f32.mrf.mxu0 }
 0x180   : > { %v903_v56 = vunpack.c.h.bf16 %v874_v26  ;;  %v824_v47 = vunpack.c.l.bf16 %v795_v8  ;;  %v825_v63 = vunpack.c.h.bf16 %v795_v8  ;;  %v746_v49 = vunpack.c.l.bf16 %v716_v50 }
 0x181   : > { %v1298_v0 = vpack.c.bf16 %v1272_v55, %v1270_v15  ;;  %v1299_v12 = vpack.c.bf16 %v1273_v25, %v1271_v51  ;;  %v747_v16 = vunpack.c.h.bf16 %v716_v50  ;;  %v1028_v23 = vpack.c.bf16 %v2788_v6, %v2785_v41 }
 0x182   : > { %v953_v42 = vpack.c.bf16 %v933_v2, %v932_v59  ;;  %v856_v3 = vmul.f32 %v824_v47, %v2857_v34  ;;  %v857_v22 = vmul.f32 %v825_v63, %v2859_v45  ;;  %v637_v39 = vmul.f32 0.5, %v2698_v43 }
 0x183   : > { %1460 = vmatmul.bf16.gmra.mxu2 %v1298_v0  ;;  %1509 = vmatmul.bf16.gmra.mxu3 %v1299_v12  ;;  %v778_v33 = vmul.f32 %v746_v49, %v2870_v40  ;;  %v779_v27 = vmul.f32 %v747_v16, %v2874_v46  ;;  %v1029_v44 = vpack.c.bf16 %v2796_v7, %v2794_v1  ;;  %v1050_v26 = vunpack.c.l.bf16 %v1028_v23  ;;  %v571_v1 = vpop.f32.mrf.mxu1 }
 0x184   : > { %v934_v31 = vadd.f32 %v902_v62, %v2830_v37  ;;  %v935_v41 = vadd.f32 %v903_v56, %v2832_v35  ;;  %v875_v6 = vpack.c.bf16 %v857_v22, %v856_v3  ;;  %v1051_v10 = vunpack.c.h.bf16 %v1028_v23 }
 0x185   : > { %v796_v19 = vpack.c.bf16 %v779_v27, %v778_v33  ;;  %v1052_v32 = vunpack.c.l.bf16 %v1029_v44  ;;  %v1053_v17 = vunpack.c.h.bf16 %v1029_v44  ;;  %2109 = vtanh.f32 %v1050_v26 }
 0x186   : > { %v980_v43 = vunpack.c.l.bf16 %v953_v42  ;;  %v904_v59 = vunpack.c.l.bf16 %v875_v6  ;;  %v905_v13 = vunpack.c.h.bf16 %v875_v6  ;;  %2111 = vtanh.f32 %v1051_v10 }
 0x187   : > { %v981_v2 = vunpack.c.h.bf16 %v953_v42  ;;  %v826_v8 = vunpack.c.l.bf16 %v796_v19  ;;  %v827_v50 = vunpack.c.h.bf16 %v796_v19  ;;  %2113 = vtanh.f32 %v1052_v32 }
 0x188   : > { %v1009_v7 = vmul.f32 0.796875, %v977_v14  ;;  %v2898_v62 = vpack.c.bf16 %v935_v41, %v934_v31  ;;  %v2900_v15 = vpack.c.bf16 %v635_v48, %v634_v11  ;;  %2115 = vtanh.f32 %v1053_v17 }
 0x189   : > { %v858_v55 = vmul.f32 %v826_v8, %v2870_v40  ;;  %v859_v51 = vmul.f32 %v827_v50, %v2874_v46  ;;  %v2904_v25 = vpack.c.bf16 %v637_v39, %v636_v61  ;;  %v523_v56 = vadd.f32 %v522_v60, %v2574_v57 }
 0x18a   : > { %v2909_v47 = vmul.f32 0.796875, %v978_v21  ;;  %v936_v29 = vadd.f32 %v904_v59, %v2857_v34  ;;  %v937_v14 = vadd.f32 %v905_v13, %v2859_v45  ;;  %v572_v11 = vadd.f32 %v571_v1, %v2576_v58 }
 0x18b   : > { %v2110_v48 = vpop.eup %2109  ;;  %v2916_v63 = vmul.f32 0.796875, %v979_v28  ;;  %v2918_v49 = vmul.f32 0.796875, %v980_v43  ;;  %v2920_v61 = vmul.f32 0.796875, %v981_v2  ;;  %v876_v57 = vpack.c.bf16 %v859_v51, %v858_v55 }
 0x18c   : > { %v2112_v0 = vpop.eup %2111  ;;  %v982_v21 = vunpack.c.l.bf16 %v2898_v62  ;;  %v983_v12 = vunpack.c.h.bf16 %v2898_v62  ;;  %v1210_v16 = vunpack.c.l.bf16 %v2900_v15  ;;  %v589_v23 = vpack.c.bf16 %v572_v11, %v523_v56 }
 0x18d   : > { %v2114_v42 = vpop.eup %2113  ;;  %v1108_v58 = vpack.c.bf16 %v2112_v0, %v2110_v48  ;;  %v1212_v3 = vunpack.c.l.bf16 %v2904_v25  ;;  %v1211_v9 = vunpack.c.h.bf16 %v2900_v15  ;;  %v1213_v28 = vunpack.c.h.bf16 %v2904_v25 }
 0x18e   : > { %v2116_v22 = vpop.eup %2115  ;;  %v2928_v39 = vpack.c.bf16 %v937_v14, %v936_v29  ;;  %v2930_v33 = vunpack.c.l.bf16 %v589_v23  ;;  %v2932_v27 = vunpack.c.h.bf16 %v589_v23  ;;  %v638_v44 = vmul.f32 0.5, %v2711_v24 }
 0x18f   : > { %v906_v26 = vunpack.c.l.bf16 %v876_v57  ;;  %v1109_v31 = vpack.c.bf16 %v2116_v22, %v2114_v42  ;;  %v1130_v41 = vunpack.c.l.bf16 %v1108_v58  ;;  %v1030_v6 = vpack.c.bf16 %v2836_v36, %v2834_v4 }
 0x190   : > { %v907_v10 = vunpack.c.h.bf16 %v876_v57  ;;  %v1131_v19 = vunpack.c.h.bf16 %v1108_v58  ;;  %v700_v32 = vmul.f32 0.044677734, %v2930_v33  ;;  %v701_v17 = vmul.f32 0.044677734, %v2932_v27 }
 0x191   : > { %v1132_v43 = vunpack.c.l.bf16 %v1109_v31  ;;  %v1133_v59 = vunpack.c.h.bf16 %v1109_v31  ;;  %v1162_v13 = vadd.f32 1.0, %v1130_v41  ;;  %v1031_v60 = vpack.c.bf16 %v1009_v7, %v2854_v54 }
 0x192   : > { %v1163_v2 = vadd.f32 1.0, %v1131_v19  ;;  %v717_v8 = vpack.c.bf16 %v701_v17, %v700_v32  ;;  %v639_v24 = vmul.f32 0.5, %v2713_v20  ;;  %v640_v50 = vmul.f32 0.5, %v2752_v38 }
 0x193   : > { %v938_v1 = vadd.f32 %v906_v26, %v2870_v40  ;;  %v1164_v4 = vadd.f32 1.0, %v1132_v43  ;;  %v1165_v36 = vadd.f32 1.0, %v1133_v59  ;;  %v1054_v15 = vunpack.c.l.bf16 %v1030_v6 }
 0x194   : > { %v1188_v55 = vpack.c.bf16 %v1163_v2, %v1162_v13  ;;  %v748_v51 = vunpack.c.l.bf16 %v717_v8  ;;  %v749_v25 = vunpack.c.h.bf16 %v717_v8  ;;  %v1055_v56 = vunpack.c.h.bf16 %v1030_v6 }
 0x195   : > { %v939_v29 = vadd.f32 %v907_v10, %v2874_v46  ;;  %v1189_v14 = vpack.c.bf16 %v1165_v36, %v1164_v4  ;;  %v1056_v11 = vunpack.c.l.bf16 %v1031_v60  ;;  %v1057_v54 = vunpack.c.h.bf16 %v1031_v60 }
 0x196   : > { %v1242_v7 = vunpack.c.l.bf16 %v1188_v55  ;;  %v1243_v48 = vunpack.c.h.bf16 %v1188_v55  ;;  %v780_v20 = vmul.f32 %v748_v51, %v2930_v33  ;;  %v781_v38 = vmul.f32 %v749_v25, %v2932_v27 }
 0x197   : > { %v1244_v57 = vunpack.c.l.bf16 %v1189_v14  ;;  %v1245_v0 = vunpack.c.h.bf16 %v1189_v14  ;;  %v641_v23 = vmul.f32 0.5, %v2754_v18  ;;  %2117 = vtanh.f32 %v1054_v15 }
 0x198   : > { %v984_v42 = vunpack.c.l.bf16 %v2928_v39  ;;  %v1274_v58 = vmul.f32 %v1242_v7, %v1210_v16  ;;  %v797_v22 = vpack.c.bf16 %v781_v38, %v780_v20  ;;  %2119 = vtanh.f32 %v1055_v56 }
 0x199   : > { %v1276_v26 = vmul.f32 %v1244_v57, %v1212_v3  ;;  %v1275_v31 = vmul.f32 %v1243_v48, %v1211_v9  ;;  %v1277_v41 = vmul.f32 %v1245_v0, %v1213_v28  ;;  %2121 = vtanh.f32 %v1056_v11 }
 0x19a   : > { %v956_v6 = vpack.c.bf16 %v939_v29, %v938_v1  ;;  %v828_v10 = vunpack.c.l.bf16 %v797_v22  ;;  %v829_v19 = vunpack.c.h.bf16 %v797_v22  ;;  %2123 = vtanh.f32 %v1057_v54 }
 0x19b   : > { %v1300_v32 = vpack.c.bf16 %v1276_v26, %v1274_v58  ;;  %v1301_v17 = vpack.c.bf16 %v1277_v41, %v1275_v31  ;;  %v1014_v43 = vmul.f32 0.796875, %v982_v21  ;;  %v1015_v18 = vmul.f32 0.796875, %v983_v12 }
 0x19c   : > { %v860_v16 = vmul.f32 %v828_v10, %v2930_v33  ;;  %v861_v59 = vmul.f32 %v829_v19, %v2932_v27  ;;  %v985_v9 = vunpack.c.h.bf16 %v2928_v39  ;;  %v2955_v28 = vpack.c.bf16 %v639_v24, %v638_v44 }
 0x19d   : > { %v2118_v3 = vpop.eup %2117  ;;  %1465 = vmatmul.bf16.gmra.mxu2 %v1300_v32  ;;  %1514 = vmatmul.bf16.gmra.mxu3 %v1301_v17  ;;  %v1032_v13 = vpack.c.bf16 %v2916_v63, %v2909_v47  ;;  %v1033_v21 = vpack.c.bf16 %v2920_v61, %v2918_v49  ;;  %v1016_v62 = vmul.f32 0.796875, %v984_v42  ;;  %v986_v12 = vunpack.c.l.bf16 %v956_v6 }
 0x19e   : > { %v2120_v60 = vpop.eup %2119  ;;  %v877_v2 = vpack.c.bf16 %v861_v59, %v860_v16  ;;  %v663_v8 = vpack.c.bf16 %v641_v23, %v640_v50  ;;  %v987_v4 = vunpack.c.h.bf16 %v956_v6  ;;  %v1017_v49 = vmul.f32 0.796875, %v985_v9 }
 0x19f   : > { %v2122_v1 = vpop.eup %2121  ;;  %v1110_v36 = vpack.c.bf16 %v2120_v60, %v2118_v3  ;;  %v1058_v15 = vunpack.c.l.bf16 %v1032_v13  ;;  %v1059_v39 = vunpack.c.h.bf16 %v1032_v13  ;;  %v1060_v24 = vunpack.c.l.bf16 %v1033_v21 }
 0x1a0   : > { %v2124_v55 = vpop.eup %2123  ;;  %v908_v51 = vunpack.c.l.bf16 %v877_v2  ;;  %v909_v44 = vunpack.c.h.bf16 %v877_v2  ;;  %v1061_v25 = vunpack.c.h.bf16 %v1033_v21  ;;  %v1018_v7 = vmul.f32 0.796875, %v986_v12 }
 0x1a1   : > { %v1111_v56 = vpack.c.bf16 %v2124_v55, %v2122_v1  ;;  %v1134_v47 = vunpack.c.l.bf16 %v1110_v36  ;;  %v1135_v63 = vunpack.c.h.bf16 %v1110_v36  ;;  %2125 = vtanh.f32 %v1058_v15 }
 0x1a2   : > { %v940_v61 = vadd.f32 %v908_v51, %v2930_v33  ;;  %v941_v29 = vadd.f32 %v909_v44, %v2932_v27  ;;  %2127 = vtanh.f32 %v1059_v39  ;;  %v1019_v48 = vmul.f32 0.796875, %v987_v4 }
 0x1a3   : > { %v1136_v50 = vunpack.c.l.bf16 %v1111_v56  ;;  %v1137_v14 = vunpack.c.h.bf16 %v1111_v56  ;;  %v1166_v11 = vadd.f32 1.0, %v1134_v47  ;;  %v1167_v54 = vadd.f32 1.0, %v1135_v63 }
 0x1a4   : > { %v957_v20 = vpack.c.bf16 %v941_v29, %v940_v61  ;;  %2129 = vtanh.f32 %v1060_v24  ;;  %v1214_v23 = vunpack.c.l.bf16 %v2955_v28  ;;  %v1216_v42 = vunpack.c.l.bf16 %v663_v8 }
 0x1a5   : > { %v1168_v38 = vadd.f32 1.0, %v1136_v50  ;;  %v1169_v57 = vadd.f32 1.0, %v1137_v14  ;;  %v1190_v0 = vpack.c.bf16 %v1167_v54, %v1166_v11  ;;  %2131 = vtanh.f32 %v1061_v25 }
 0x1a6   : > { %v1215_v58 = vunpack.c.h.bf16 %v2955_v28  ;;  %v1217_v22 = vunpack.c.h.bf16 %v663_v8  ;;  %v642_v10 = vmul.f32 0.5, %v2765_v52  ;;  %v643_v32 = vmul.f32 0.5, %v2767_v53 }
 0x1a7   : > { %v2126_v26 = vpop.eup %2125  ;;  %v1191_v31 = vpack.c.bf16 %v1169_v57, %v1168_v38  ;;  %v1246_v41 = vunpack.c.l.bf16 %v1190_v0  ;;  %v1247_v6 = vunpack.c.h.bf16 %v1190_v0  ;;  %v644_v17 = vmul.f32 0.5, %v2803_v5 }
 0x1a8   : > { %v2128_v19 = vpop.eup %2127  ;;  %v645_v16 = vmul.f32 0.5, %v2806_v30  ;;  %v1034_v59 = vpack.c.bf16 %v1015_v18, %v1014_v43  ;;  %v988_v3 = vunpack.c.l.bf16 %v957_v20  ;;  %v989_v9 = vunpack.c.h.bf16 %v957_v20 }
 0x1a9   : > { %v1248_v13 = vunpack.c.l.bf16 %v1191_v31  ;;  %v1249_v21 = vunpack.c.h.bf16 %v1191_v31  ;;  %v1278_v60 = vmul.f32 %v1246_v41, %v1214_v23  ;;  %v1112_v12 = vpack.c.bf16 %v2128_v19, %v2126_v26 }
 0x1aa   : > { %v2130_v28 = vpop.eup %2129  ;;  %v1035_v2 = vpack.c.bf16 %v1017_v49, %v1016_v62  ;;  %v1062_v8 = vunpack.c.l.bf16 %v1034_v59  ;;  %v1279_v52 = vmul.f32 %v1247_v6, %v1215_v58  ;;  %v1063_v15 = vunpack.c.h.bf16 %v1034_v59 }
 0x1ab   : > { %v2132_v1 = vpop.eup %2131  ;;  %v1280_v4 = vmul.f32 %v1248_v13, %v1216_v42  ;;  %v1281_v36 = vmul.f32 %v1249_v21, %v1217_v22  ;;  %v1138_v39 = vunpack.c.l.bf16 %v1112_v12  ;;  %v1139_v5 = vunpack.c.h.bf16 %v1112_v12 }
 0x1ac   : > { %v1113_v53 = vpack.c.bf16 %v2132_v1, %v2130_v28  ;;  %v1064_v55 = vunpack.c.l.bf16 %v1035_v2  ;;  %v1065_v18 = vunpack.c.h.bf16 %v1035_v2  ;;  %2133 = vtanh.f32 %v1062_v8 }
 0x1ad   : > { %v1302_v30 = vpack.c.bf16 %v1280_v4, %v1278_v60  ;;  %v1303_v43 = vpack.c.bf16 %v1281_v36, %v1279_v52  ;;  %v1170_v24 = vadd.f32 1.0, %v1138_v39  ;;  %v1171_v25 = vadd.f32 1.0, %v1139_v5 }
 0x1ae   : > { %v1140_v51 = vunpack.c.l.bf16 %v1113_v53  ;;  %v1141_v44 = vunpack.c.h.bf16 %v1113_v53  ;;  %v1020_v56 = vmul.f32 0.796875, %v988_v3  ;;  %v1021_v62 = vmul.f32 0.796875, %v989_v9 }
 0x1af   : > { %1470 = vmatmul.bf16.gmra.mxu2 %v1302_v30  ;;  %1519 = vmatmul.bf16.gmra.mxu3 %v1303_v43  ;;  %2135 = vtanh.f32 %v1063_v15  ;;  %v1192_v49 = vpack.c.bf16 %v1171_v25, %v1170_v24  ;;  %v665_v61 = vpack.c.bf16 %v645_v16, %v644_v17  ;;  %v664_v29 = vpack.c.bf16 %v643_v32, %v642_v10 }
 0x1b0   : > { %v1172_v47 = vadd.f32 1.0, %v1140_v51  ;;  %v1173_v63 = vadd.f32 1.0, %v1141_v44  ;;  %2137 = vtanh.f32 %v1064_v55  ;;  %v1036_v14 = vpack.c.bf16 %v1019_v48, %v1018_v7 }
 0x1b1   : > { %2139 = vtanh.f32 %v1065_v18  ;;  %v1037_v54 = vpack.c.bf16 %v1021_v62, %v1020_v56  ;;  %v1250_v20 = vunpack.c.l.bf16 %v1192_v49  ;;  %v1220_v23 = vunpack.c.l.bf16 %v665_v61 }
 0x1b2   : > { %v1193_v50 = vpack.c.bf16 %v1173_v63, %v1172_v47  ;;  %v2134_v11 = vpop.eup %2133  ;;  %v1221_v42 = vunpack.c.h.bf16 %v665_v61  ;;  %v1251_v58 = vunpack.c.h.bf16 %v1192_v49  ;;  %v1066_v22 = vunpack.c.l.bf16 %v1036_v14 }
 0x1b3   : > { %v1218_v31 = vunpack.c.l.bf16 %v664_v29  ;;  %v1068_v6 = vunpack.c.l.bf16 %v1037_v54  ;;  %v1219_v16 = vunpack.c.h.bf16 %v664_v29  ;;  %v1069_v32 = vunpack.c.h.bf16 %v1037_v54 }
 0x1b4   : > { %v1252_v38 = vunpack.c.l.bf16 %v1193_v50  ;;  %v1253_v57 = vunpack.c.h.bf16 %v1193_v50  ;;  %v1067_v59 = vunpack.c.h.bf16 %v1036_v14  ;;  %2141 = vtanh.f32 %v1066_v22 }
 0x1b5   : > { %v2136_v0 = vpop.eup %2135  ;;  %v1282_v7 = vmul.f32 %v1250_v20, %v1218_v31  ;;  %v1283_v3 = vmul.f32 %v1251_v58, %v1219_v16  ;;  %2143 = vtanh.f32 %v1068_v6  ;;  %v648_v2 = vmul.f32 0.5, %v2857_v34 }
 0x1b6   : > { %v2138_v26 = vpop.eup %2137  ;;  %v1114_v41 = vpack.c.bf16 %v2136_v0, %v2134_v11  ;;  %v1284_v17 = vmul.f32 %v1252_v38, %v1220_v23  ;;  %v1285_v10 = vmul.f32 %v1253_v57, %v1221_v42  ;;  %2145 = vtanh.f32 %v1069_v32  ;;  %v2976_v57 = vld [vmem:[%s3084_s4] ss:$0 sm:$0xff] }
 0x1b7   : > { %v2140_v19 = vpop.eup %2139  ;;  %v649_v8 = vmul.f32 0.5, %v2859_v45  ;;  %2147 = vtanh.f32 %v1067_v59  ;;  %v646_v15 = vmul.f32 0.5, %v2830_v37  ;;  %v647_v53 = vmul.f32 0.5, %v2832_v35  ;;  %v310_v32 = vld [vmem:[%s2552_s8] sm:$0xff]  }
 0x1b8   : > { %v1115_v48 = vpack.c.bf16 %v2140_v19, %v2138_v26  ;;  %v1142_v9 = vunpack.c.l.bf16 %v1114_v41  ;;  %v1143_v13 = vunpack.c.h.bf16 %v1114_v41  ;;  %v1304_v60 = vpack.c.bf16 %v1284_v17, %v1282_v7 }
 0x1b9   : > { %v1305_v12 = vpack.c.bf16 %v1285_v10, %v1283_v3  ;;  %v667_v30 = vpack.c.bf16 %v649_v8, %v648_v2  ;;  %v666_v51 = vpack.c.bf16 %v647_v53, %v646_v15  ;;  %v652_v26 = vmul.f32 0.5, %v2930_v33 }
 0x1ba   : > { %v1144_v21 = vunpack.c.l.bf16 %v1115_v48  ;;  %v1145_v28 = vunpack.c.h.bf16 %v1115_v48  ;;  %v1174_v52 = vadd.f32 1.0, %v1142_v9  ;;  %v1175_v36 = vadd.f32 1.0, %v1143_v13  ;;  %v2142_v39 = vpop.eup %2141 }
 0x1bb   : > { %v2144_v55 = vpop.eup %2143  ;;  %v1224_v25 = vunpack.c.l.bf16 %v667_v30  ;;  %v1225_v62 = vunpack.c.h.bf16 %v667_v30  ;;  %v1222_v63 = vunpack.c.l.bf16 %v666_v51  ;;  %v1223_v35 = vunpack.c.h.bf16 %v666_v51 }
 0x1bc   : > { %v1176_v1 = vadd.f32 1.0, %v1144_v21  ;;  %v1177_v4 = vadd.f32 1.0, %v1145_v28  ;;  %v2146_v43 = vpop.eup %2145  ;;  %v1194_v34 = vpack.c.bf16 %v1175_v36, %v1174_v52  ;;  %v653_v31 = vmul.f32 0.5, %v2932_v27 }
 0x1bd   : > { %v2148_v18 = vpop.eup %2147  ;;  %v1117_v24 = vpack.c.bf16 %v2146_v43, %v2144_v55  ;;  %v650_v17 = vmul.f32 0.5, %v2870_v40  ;;  %v651_v16 = vmul.f32 0.5, %v2874_v46  ;;  %v1540_v9 = vunpack.c.l.bf16 %v310_v32 }
 0x1be   : > { %v1195_v5 = vpack.c.bf16 %v1177_v4, %v1176_v1  ;;  %v1254_v56 = vunpack.c.l.bf16 %v1194_v34  ;;  %v1255_v47 = vunpack.c.h.bf16 %v1194_v34  ;;  %v1116_v37 = vpack.c.bf16 %v2148_v18, %v2142_v39 }
 0x1bf   : > { %1475 = vmatmul.bf16.gmra.mxu2 %v1304_v60  ;;  %1524 = vmatmul.bf16.gmra.mxu3 %v1305_v12  ;;  %v1148_v29 = vunpack.c.l.bf16 %v1117_v24  ;;  %v1149_v50 = vunpack.c.h.bf16 %v1117_v24  ;;  %v669_v7 = vpack.c.bf16 %v653_v31, %v652_v26  ;;  %v1541_v27 = vunpack.c.h.bf16 %v310_v32 }
 0x1c0   : > { %v1256_v45 = vunpack.c.l.bf16 %v1195_v5  ;;  %v1257_v44 = vunpack.c.h.bf16 %v1195_v5  ;;  %v1286_v14 = vmul.f32 %v1254_v56, %v1222_v63  ;;  %v1287_v11 = vmul.f32 %v1255_v47, %v1223_v35 }
 0x1c1   : > { %v1146_v54 = vunpack.c.l.bf16 %v1116_v37  ;;  %v1147_v20 = vunpack.c.h.bf16 %v1116_v37  ;;  %v1180_v42 = vadd.f32 1.0, %v1148_v29  ;;  %v1181_v58 = vadd.f32 1.0, %v1149_v50 }
 0x1c2   : > { %v1288_v49 = vmul.f32 %v1256_v45, %v1224_v25  ;;  %v1289_v61 = vmul.f32 %v1257_v44, %v1225_v62  ;;  %v668_v13 = vpack.c.bf16 %v651_v16, %v650_v17  ;;  %v1228_v2 = vunpack.c.l.bf16 %v669_v7  ;;  %v312_v45 = vld [vmem:[%s2552_s8 + $0x8] sm:$0xff]  }
 0x1c3   : > { %v1178_v41 = vadd.f32 1.0, %v1146_v54  ;;  %v1179_v6 = vadd.f32 1.0, %v1147_v20  ;;  %v1197_v10 = vpack.c.bf16 %v1181_v58, %v1180_v42  ;;  %v1229_v8 = vunpack.c.h.bf16 %v669_v7 }
 0x1c4   : > { %v1306_v0 = vpack.c.bf16 %v1288_v49, %v1286_v14  ;;  %v1307_v23 = vpack.c.bf16 %v1289_v61, %v1287_v11  ;;  %v1226_v52 = vunpack.c.l.bf16 %v668_v13  ;;  %v1227_v15 = vunpack.c.h.bf16 %v668_v13  ;;  %v314_v14 = vld [vmem:[%s2552_s8 + $0x10] sm:$0xff]  }
 0x1c5   : > { %v1196_v48 = vpack.c.bf16 %v1179_v6, %v1178_v41  ;;  %v1260_v21 = vunpack.c.l.bf16 %v1197_v10  ;;  %v1261_v28 = vunpack.c.h.bf16 %v1197_v10  ;;  %v1542_v25 = vunpack.c.l.bf16 %v312_v45 }
 0x1c6   : > { %v1543_v62 = vunpack.c.h.bf16 %v312_v45  ;;  %v1544_v20 = vunpack.c.l.bf16 %v314_v14 }
 0x1c7   : > { %v1258_v40 = vunpack.c.l.bf16 %v1196_v48  ;;  %v1259_v46 = vunpack.c.h.bf16 %v1196_v48  ;;  %v1292_v36 = vmul.f32 %v1260_v21, %v1228_v2  ;;  %v1293_v53 = vmul.f32 %v1261_v28, %v1229_v8  ;;  %v318_v28 = vld [vmem:[%s2552_s8 + $0x20] sm:$0xff]  }
 0x1c9   : > { %v1451_v38 = vpop.f32.mrf.mxu2  ;;  %v1290_v5 = vmul.f32 %v1258_v40, %v1226_v52  ;;  %v1291_v55 = vmul.f32 %v1259_v46, %v1227_v15  ;;  %v1548_v40 = vunpack.c.l.bf16 %v318_v28  ;;  %v1549_v46 = vunpack.c.h.bf16 %v318_v28 }
 0x1ca   : > { %v1452_v19 = vadd.f32 %v2976_v57, %v1451_v38 }
 0x1cb   : > { %v1500_v22 = vpop.f32.mrf.mxu3  ;;  %v1308_v30 = vpack.c.bf16 %v1292_v36, %v1290_v5  ;;  %v1309_v43 = vpack.c.bf16 %v1293_v53, %v1291_v55  ;;  %v320_v5 = vld [vmem:[%s2552_s8 + $0x28] sm:$0xff]  }
 0x1cc   : > { %v1501_v3 = vadd.f32 %v1500_v22, %v1452_v19  ;;  %v316_v19 = vld [vmem:[%s2552_s8 + $0x18] sm:$0xff]  }
 0x1cd   : > { %v1546_v32 = vunpack.c.l.bf16 %v316_v19  ;;  %v1547_v48 = vunpack.c.h.bf16 %v316_v19 }
 0x1ce   : > { %v1556_v1 = vadd.f32 %v1540_v9, %v1501_v3 }
 0x1cf   : > { %1480 = vmatmul.bf16.gmra.mxu2 %v1306_v0  ;;  %1529 = vmatmul.bf16.gmra.mxu3 %v1307_v23  ;;  %v1545_v0 = vunpack.c.h.bf16 %v314_v14 }
 0x1d1   : > { %v1453_v59 = vpop.f32.mrf.mxu2 }
 0x1d2   : > { %v1454_v33 = vadd.f32 %v2976_v57, %v1453_v59 }
 0x1d3   : > { %v1502_v60 = vpop.f32.mrf.mxu3 }
 0x1d4   : > { %v1503_v12 = vadd.f32 %v1502_v60, %v1454_v33 }
 0x1d6   : > { %v1557_v4 = vadd.f32 %v1541_v27, %v1503_v12 }
 0x1d8   : > { %v1962_v39 = vpack.c.bf16 %v1557_v4, %v1556_v1 }
 0x1da   : > { %1963 = vst [vmem:[%s2987_s23] sm:$0xff] %v1962_v39  }
 0x1df   : > { %1485 = vmatmul.bf16.gmra.mxu2 %v1308_v30  ;;  %1534 = vmatmul.bf16.gmra.mxu3 %v1309_v43 }
 0x1ec   : > { %v1456_v34 = vpop.f32.mrf.mxu2  ;;  %v1505_v18 = vpop.f32.mrf.mxu3 }
 0x1ed   : > { %v1457_v51 = vadd.f32 %v2976_v57, %v1456_v34  ;;  %v1550_v34 = vunpack.c.l.bf16 %v320_v5 }
 0x1ef   : > { %v1506_v24 = vadd.f32 %v1505_v18, %v1457_v51  ;;  %v1551_v51 = vunpack.c.h.bf16 %v320_v5 }
 0x1f1   : > { %v1558_v63 = vadd.f32 %v1542_v25, %v1506_v24 }
 0x1f4   : > { %v1458_v44 = vpop.f32.mrf.mxu2  ;;  %v1507_v47 = vpop.f32.mrf.mxu3 }
 0x1f5   : > { %v1459_v56 = vadd.f32 %v2976_v57, %v1458_v44 }
 0x1f7   : > { %v1508_v37 = vadd.f32 %v1507_v47, %v1459_v56 }
 0x1f9   : > { %v1559_v35 = vadd.f32 %v1543_v62, %v1508_v37  ;;  %v322_v37 = vld [vmem:[%s2552_s8 + $0x30] sm:$0xff]  }
 0x1fb   : > { %v1967_v49 = vpack.c.bf16 %v1559_v35, %v1558_v63 }
 0x1fd   : > { %1999 = vst [vmem:[%s2987_s23 + $0x8] sm:$0xff] %v1967_v49  }
 0x206   : > { %v1461_v61 = vpop.f32.mrf.mxu2  ;;  %v1510_v29 = vpop.f32.mrf.mxu3 }
 0x207   : > { %v1462_v50 = vadd.f32 %v2976_v57, %v1461_v61  ;;  %v1552_v61 = vunpack.c.l.bf16 %v322_v37 }
 0x209   : > { %v1511_v54 = vadd.f32 %v1510_v29, %v1462_v50  ;;  %v1553_v50 = vunpack.c.h.bf16 %v322_v37 }
 0x20b   : > { %v1560_v58 = vadd.f32 %v1544_v20, %v1511_v54 }
 0x20e   : > { %v1463_v11 = vpop.f32.mrf.mxu2  ;;  %v1512_v23 = vpop.f32.mrf.mxu3 }
 0x20f   : > { %v1464_v38 = vadd.f32 %v2976_v57, %v1463_v11 }
 0x211   : > { %v1513_v42 = vadd.f32 %v1512_v23, %v1464_v38 }
 0x213   : > { %v1561_v22 = vadd.f32 %v1545_v0, %v1513_v42  ;;  %v324_v42 = vld [vmem:[%s2552_s8 + $0x38] sm:$0xff]  }
 0x215   : > { %v1972_v26 = vpack.c.bf16 %v1561_v22, %v1560_v58 }
 0x217   : > { %2000 = vst [vmem:[%s2987_s23 + $0x10] sm:$0xff] %v1972_v26   ;;  %v1554_v26 = vunpack.c.l.bf16 %v324_v42 }
 0x220   : > { %v1466_v31 = vpop.f32.mrf.mxu2  ;;  %v1515_v41 = vpop.f32.mrf.mxu3 }
 0x221   : > { %v1467_v6 = vadd.f32 %v2976_v57, %v1466_v31 }
 0x223   : > { %v1516_v10 = vadd.f32 %v1515_v41, %v1467_v6  ;;  %v1555_v41 = vunpack.c.h.bf16 %v324_v42 }
 0x225   : > { %v1562_v3 = vadd.f32 %v1546_v32, %v1516_v10 }
 0x228   : > { %v1468_v17 = vpop.f32.mrf.mxu2  ;;  %v1517_v16 = vpop.f32.mrf.mxu3 }
 0x229   : > { %v1469_v7 = vadd.f32 %v2976_v57, %v1468_v17 }
 0x22b   : > { %v1518_v59 = vadd.f32 %v1517_v16, %v1469_v7 }
 0x22d   : > { %v1563_v9 = vadd.f32 %v1547_v48, %v1518_v59 }
 0x22f   : > { %v1977_v33 = vpack.c.bf16 %v1563_v9, %v1562_v3 }
 0x231   : > { %2001 = vst [vmem:[%s2987_s23 + $0x18] sm:$0xff] %v1977_v33  }
 0x232   : > { %v1471_v27 = vpop.f32.mrf.mxu2  ;;  %v1520_v13 = vpop.f32.mrf.mxu3 }
 0x233   : > { %v1472_v21 = vadd.f32 %v2976_v57, %v1471_v27 }
 0x235   : > { %v1521_v2 = vadd.f32 %v1520_v13, %v1472_v21 }
 0x237   : > { %v1564_v4 = vadd.f32 %v1548_v40, %v1521_v2 }
 0x23a   : > { %v1473_v60 = vpop.f32.mrf.mxu2  ;;  %v1522_v12 = vpop.f32.mrf.mxu3 }
 0x23b   : > { %v1474_v8 = vadd.f32 %v2976_v57, %v1473_v60 }
 0x23d   : > { %v1523_v1 = vadd.f32 %v1522_v12, %v1474_v8 }
 0x23f   : > { %v1565_v52 = vadd.f32 %v1549_v46, %v1523_v1 }
 0x241   : > { %v1982_v36 = vpack.c.bf16 %v1565_v52, %v1564_v4 }
 0x242   : > { %v1476_v15 = vpop.f32.mrf.mxu2  ;;  %v1525_v53 = vpop.f32.mrf.mxu3 }
 0x243   : > { %2002 = vst [vmem:[%s2987_s23 + $0x20] sm:$0xff] %v1982_v36   ;;  %v1477_v39 = vadd.f32 %v2976_v57, %v1476_v15 }
 0x245   : > { %v1526_v43 = vadd.f32 %v1525_v53, %v1477_v39 }
 0x247   : > { %v1566_v44 = vadd.f32 %v1550_v34, %v1526_v43 }
 0x24a   : > { %v1478_v55 = vpop.f32.mrf.mxu2  ;;  %v1527_v30 = vpop.f32.mrf.mxu3 }
 0x24b   : > { %v1479_v18 = vadd.f32 %v2976_v57, %v1478_v55 }
 0x24d   : > { %v1528_v45 = vadd.f32 %v1527_v30, %v1479_v18 }
 0x24f   : > { %v1567_v24 = vadd.f32 %v1551_v51, %v1528_v45 }
 0x251   : > { %v1987_v25 = vpack.c.bf16 %v1567_v24, %v1566_v44 }
 0x252   : > { %v1481_v56 = vpop.f32.mrf.mxu2  ;;  %v1530_v62 = vpop.f32.mrf.mxu3 }
 0x253   : > { %2003 = vst [vmem:[%s2987_s23 + $0x28] sm:$0xff] %v1987_v25   ;;  %v1482_v47 = vadd.f32 %v2976_v57, %v1481_v56 }
 0x255   : > { %v1531_v49 = vadd.f32 %v1530_v62, %v1482_v47 }
 0x257   : > { %v1568_v11 = vadd.f32 %v1552_v61, %v1531_v49 }
 0x25a   : > { %v1483_v63 = vpop.f32.mrf.mxu2  ;;  %v1532_v35 = vpop.f32.mrf.mxu3 }
 0x25b   : > { %v1484_v29 = vadd.f32 %v2976_v57, %v1483_v63 }
 0x25d   : > { %v1533_v14 = vadd.f32 %v1532_v35, %v1484_v29 }
 0x25f   : > { %v1569_v54 = vadd.f32 %v1553_v50, %v1533_v14 }
 0x261   : > { %v1992_v20 = vpack.c.bf16 %v1569_v54, %v1568_v11 }
 0x262   : > { %v1486_v38 = vpop.f32.mrf.mxu2  ;;  %v1535_v0 = vpop.f32.mrf.mxu3 }
 0x263   : > { %2004 = vst [vmem:[%s2987_s23 + $0x30] sm:$0xff] %v1992_v20   ;;  %v1487_v23 = vadd.f32 %v2976_v57, %v1486_v38 }
 0x265   : > { %v1536_v22 = vadd.f32 %v1535_v0, %v1487_v23 }
 0x267   : > { %v1570_v17 = vadd.f32 %v1554_v26, %v1536_v22 }
 0x26a   : > { %v1488_v58 = vpop.f32.mrf.mxu2  ;;  %v1537_v6 = vpop.f32.mrf.mxu3 }
 0x26b   : > { %v1489_v31 = vadd.f32 %v2976_v57, %v1488_v58 }
 0x26d   : > { %v1538_v19 = vadd.f32 %v1537_v6, %v1489_v31 }
 0x26f   : > { %v1571_v16 = vadd.f32 %v1555_v41, %v1538_v19  ;;  %1611 = sbr.rel (!%p2460_p11) target bundleno = 659 (0x293), region = 60 }
 0x271   : > { %v1997_v10 = vpack.c.bf16 %v1571_v16, %v1570_v17 }
 0x273   : > { %2005 = vst [vmem:[%s2987_s23 + $0x38] sm:$0xff] %v1997_v10  }
 0x274   : > { %s3111_s14 = smov (!%p1614_p6, %s1613_s14), 16 }
 0x275   : > { %s1910_s15 = sshll.u32 %s3111_s14, 2 }
 0x276   : > { %s1617_s10 = ssub.s32 64, %s1910_s15 }
 0x277   : > { %s1618_s9 = sshll.u32 %s1617_s10, 4 }
 0x278   : > { %1619 = vsyncadd %s1605_s1, %s1618_s9  ;;  %p3027_p9 = scmp.ne.s32.totalorder %s1910_s15, 0  ;;  %s1958_s11 = sshll.u32 %s2429_s22, 6 }
 0x279   : > { %s1622_s12 = scalar_lea.hbm %s3085_s5, %s1958_s11  ;;  %s1624_s16 = sshll.u32 %s2987_s23, 4  ;;  %s3036_s16 = int_to_ptr.vmem [resolvable:$true] %s1624_s16 }
 0x27a   : > { %s1626_s2 = sshll.u32 %s1622_s12, 4  ;;  %s1914_s26 = sshll.u32 %s3111_s14, 6  ;;  %s3038_s2 = int_to_ptr.hbm [resolvable:$true] %s1626_s2 }
 0x27b   : > { %s2278_s8 = sshra.s32 %s3036_s16, 4  ;;  %s2280_s29 = sshrl.u32 %s1914_s26, 4  ;;  %s2279_s8 = int_to_ptr.vmem [resolvable:$true] %s2278_s8 }
 0x27c   : > { %s2285_s7 = scalar_lea.vmem %s2279_s8, %s2280_s29  ;;  %s2375_s22 = smov [#allocation10]  }
 0x27d   : > { %p2286_p11 = scmp.ne.s32.totalorder %s2279_s8, %s2285_s7  ;;  %s2289_s28 = scalar_lea.vmem %s2375_s22, 128 }
 0x27e   : > { %p2291_p0 = scmp.lt.s32.totalorder %s2289_s28, %s2285_s7 }
 0x27f   : > { %p2287_p10 = pnand %p2286_p11, %p3027_p9 }
 0x281   : > { %p2288_p1 = pneg %p2287_p10 }
 0x283   : > { %p2293_p2 = pnand %p2291_p0, %p2288_p1 }
 0x285   : > { %2296 = shalt.err (!%p2293_p2)
}
 0x286   : > { %s2297_s23 = sshra.s32 %s3038_s2, 4  ;;  %s2308_s11 = scalar_lea.hbm %s3085_s5, 252  ;;  %s2298_s23 = int_to_ptr.hbm [resolvable:$true] %s2297_s23 }
 0x287   : > { %s2304_s15 = scalar_lea.hbm %s2298_s23, %s2280_s29  ;;  %p2309_p4 = scmp.lt.s32.totalorder %s2298_s23, %s3085_s5 }
 0x288   : > { %p2305_p3 = scmp.ne.s32.totalorder %s2298_s23, %s2304_s15  ;;  %p2310_p12 = scmp.lt.s32.totalorder %s2308_s11, %s2304_s15 }
 0x28a   : > { %p2306_p7 = pnand %p2305_p3, %p3027_p9  ;;  %p2311_p13 = por %p2310_p12, %p2309_p4 }
 0x28c   : > { %p2307_p8 = pneg %p2306_p7 }
 0x28e   : > { %p2312_p5 = pnand %p2311_p13, %p2307_p8 }
 0x290   : > { %2315 = shalt.err (!%p2312_p5)
}
 0x291   : > { %s2376_s12 = smov 64   ;;  %s2377_s8 = smov 4  }
 0x292   : > { %1632 = dma.vmem_to_hbm [thread:$0]  (%p3027_p9), %s3036_s16, %s1914_s26, %s3038_s2, %s1605_s1, %s2376_s12, %s2376_s12, %s2377_s8  }
 0x293 PF: > { %p2040_p6 = scmp.ge.s32.totalorder %s2363_s21, 2  ;;  %s1641_s29 = sand.u32 1, %s2351_s18  }
 0x294   : > { %p3103_p11 = scmp.ne.s32.totalorder %s3092_s6, 0  ;;  %s1642_s7 = scalar_lea.sflag [#allocation4], %s1641_s29 }
 0x296   : > { %p2031_p10 = pnand %p2040_p6, %p3103_p11 }
 0x298   : > { %p2032_p1 = pneg %p2031_p10 }
 0x29a   : > { %2346 = dma.done.wait (%p2032_p1), %s1642_s7, 1024  }
 0x29b   : > { %2348 = vsyncadd (%p2032_p1), %s1642_s7, 4294966272  ;;  %p20_p0 = scmp.ge.s32.totalorder %s2433_s24, 6   ;;  %s3104_s18 = smov %s2355_s19 }
 0x29c   : > { %s3105_s19 = smov %s2359_s20  ;;  %s3106_s20 = smov %s2445_s27 }
 0x29d   : > { %s3107_s21 = smov %s2433_s24  ;;  %22 = sbr.rel (!%p20_p0) target bundleno = 10 (0xa), region = 97 }
 0x2a2   :  { %1648 = vsyncpa [#allocation3], 1 }
 0x2a3   :  { %1650 = vsyncpa [#allocation3 + $0x1], 1 }
 0x2a4   :  { %1651 = vsyncpa [#allocation6], 1 }
 0x2a5   :  { %1652 = vsyncpa [#allocation9], 1 }
 0x2a6   :  { %1653 = vsyncpa [#allocation4], 1 }
 0x2a7   :  { %1655 = vsyncpa [#allocation4 + $0x1], 1 }

</bundles_post_ra>
